<compile_context>
chip_gen: v7x
topology: tpu7x:2x2x1
jax: 0.10.0
libtpu: 0.0.40
codegen_flags: <defaults>
</compile_context>

<pallas_src>
import numpy as np
import jax
import jax.numpy as jnp
from jax import lax
from jax.experimental import pallas as pl
from jax.experimental.pallas import tpu as pltpu


def _make_upsample2_kernel(H, W, C, MARGIN):
    """Whole forward for one batch item per grid step; intermediates never leave VMEM."""
    Wq = W + 1                 # working row stride (shared zero pad column at col W)
    L = H * Wq                 # flat spatial length (lane axis)
    f32 = jnp.float32

    # 3x3 conv taps: flat source offset (dy-1)*Wq + (dx-1).
    conv_offs = [(dy - 1) * Wq + (dx - 1) for dy in range(3) for dx in range(3)]
    # Transposed-conv source shifts (di, dj) shared by the 4 parity phases.
    tconv_offs = [di * Wq + dj for di in (0, 1) for dj in (-1, 0, 1)]

    def kernel(x_ref, w1_ref, b1_ref, w2_ref, b2_ref, wt6_ref, bt4_ref, cm_ref,
               o_ref, buf_ref):
        cm = cm_ref[...]                                    # (1, L), 0 at the pad column

        def conv3x3_relu(read, w_ref, b_ref):
            # 9 lane-dense tap matmuls, accumulator initialized by the first tap.
            acc = jnp.dot(w_ref[0], read(conv_offs[0]), preferred_element_type=f32)
            for k in range(1, 9):
                acc = acc + jnp.dot(w_ref[k], read(conv_offs[k]),
                                    preferred_element_type=f32)
            # bias + ReLU, then force the shared pad column back to zero so the next
            # stage's "virtual halo" reads stay exact.
            return jnp.maximum(acc + b_ref[...], 0.0) * cm

        # Zero only the margin strips of the activation scratch (interior is fully
        # rewritten below; margins are never stored to).
        zeros_m = jnp.zeros((C, MARGIN), f32)
        buf_ref[:, pl.ds(0, MARGIN)] = zeros_m
        buf_ref[:, pl.ds(MARGIN + L, MARGIN)] = zeros_m

        # ---- stage 1: Conv2d(2C, C, 3, p=1) + ReLU (reads the pre-padded input block)
        y1 = conv3x3_relu(lambda o: x_ref[0, :, pl.ds(MARGIN + o, L)], w1_ref, b1_ref)
        buf_ref[:, pl.ds(MARGIN, L)] = y1

        # ---- stage 2: Conv2d(C, C, 3, p=1) + ReLU (reads y1 back through the margins)
        y2 = conv3x3_relu(lambda o: buf_ref[:, pl.ds(MARGIN + o, L)], w2_ref, b2_ref)
        buf_ref[:, pl.ds(MARGIN, L)] = y2

        # ---- stage 3: ConvTranspose2d(C, C//2, (3,4), s=2, p=1, op=1) + ReLU ----
        # out[2i,  2j  ] = y2[i,j]  wt[1,1] + y2[i,j-1]wt[1,3]
        # out[2i,  2j+1] = y2[i,j+1]wt[1,0] + y2[i,j]  wt[1,2]
        # out[2i+1,2j  ] = y2[i+1,j]wt[0,1] + y2[i+1,j-1]wt[0,3] + y2[i,j]wt[2,1] + y2[i,j-1]wt[2,3]
        # out[2i+1,2j+1] = y2[i+1,j+1]wt[0,0] + y2[i+1,j]wt[0,2] + y2[i,j+1]wt[2,0] + y2[i,j]wt[2,2]
        # The 4 phases are fused per source shift: 6 matmuls with stacked (4*CH, C)
        # weights; result rows are [ee | eo | oe | oo] channel blocks.
        acc = jnp.dot(wt6_ref[0], buf_ref[:, pl.ds(MARGIN + tconv_offs[0], L)],
                      preferred_element_type=f32)
        for s in range(1, 6):
            acc = acc + jnp.dot(wt6_ref[s],
                                buf_ref[:, pl.ds(MARGIN + tconv_offs[s], L)],
                                preferred_element_type=f32)
        o_ref[0] = jnp.maximum(acc + bt4_ref[...], 0.0).astype(o_ref.dtype)

    return kernel


def upsample2_forward(x_nchw, params):
    """Pallas implementation of Upsample2.forward. Input/output are NCHW."""
    n, c2, h, w = x_nchw.shape
    c, ch = c2 // 2, c2 // 4
    wq = w + 1
    L = h * wq
    margin = w + 2                       # covers max tap offset (W+2) on both sides
    lbuf = L + 2 * margin
    f32 = jnp.float32

    # Input: add the shared zero pad column (row stride w+1), flatten the spatial dims
    # onto the lane axis, and add zero halo margins — tiny XLA glue on the input only.
    xq = jnp.pad(x_nchw.astype(f32), ((0, 0), (0, 0), (0, 0), (0, 1)))
    xflat = jnp.pad(xq.reshape(n, c2, L), ((0, 0), (0, 0), (margin, margin)))

    # Conv weights as (tap, Cout, Cin) so each tap is one (Cout,Cin)x(Cin,L) matmul.
    w1k = jnp.transpose(params["w1"], (2, 3, 0, 1)).reshape(9, c, c2).astype(f32)
    w2k = jnp.transpose(params["w2"], (2, 3, 0, 1)).reshape(9, c, c).astype(f32)
    b1 = params["b1"].reshape(c, 1).astype(f32)
    b2 = params["b2"].reshape(c, 1).astype(f32)

    # Transposed conv: stack the 4 parity-phase weights per source shift (host side).
    wt = params["wt"].astype(f32)                      # (C, CH, 3, 4) PyTorch layout

    def tap(kh, kw):
        return wt[:, :, kh, kw].T                      # (CH, C)

    zb = jnp.zeros((ch, c), f32)
    # Shift order must match the kernel: (0,-1),(0,0),(0,+1),(1,-1),(1,0),(1,+1);
    # row blocks are [ee, eo, oe, oo].
    blocks = [
        [tap(1, 3), zb,        tap(2, 3), zb       ],   # (0, -1)
        [tap(1, 1), tap(1, 2), tap(2, 1), tap(2, 2)],   # (0,  0)
        [zb,        tap(1, 0), zb,        tap(2, 0)],   # (0, +1)
        [zb,        zb,        tap(0, 3), zb       ],   # (1, -1)
        [zb,        zb,        tap(0, 1), tap(0, 2)],   # (1,  0)
        [zb,        zb,        zb,        tap(0, 0)],   # (1, +1)
    ]
    wt6 = jnp.stack([jnp.concatenate(bs, axis=0) for bs in blocks])   # (6, 4*CH, C)
    bt4 = jnp.tile(params["bt"].reshape(1, ch).astype(f32), (4, 1)).reshape(4 * ch, 1)

    # 0/1 mask zeroing the shared pad column (flat col index == w).
    cm_np = np.ones((h, wq), np.float32)
    cm_np[:, w] = 0.0
    colmask = jnp.asarray(cm_np.reshape(1, L))

    out_flat = pl.pallas_call(
        _make_upsample2_kernel(h, w, c, margin),
        out_shape=jax.ShapeDtypeStruct((n, 4 * ch, L), jnp.float32),
        grid_spec=pltpu.PrefetchScalarGridSpec(
            num_scalar_prefetch=0,
            grid=(n,),
            in_specs=[
                pl.BlockSpec((1, c2, lbuf), lambda i: (i, 0, 0)),     # x, flat+margins
                pl.BlockSpec((9, c, c2), lambda i: (0, 0, 0)),        # w1 taps
                pl.BlockSpec((c, 1), lambda i: (0, 0)),               # b1
                pl.BlockSpec((9, c, c), lambda i: (0, 0, 0)),         # w2 taps
                pl.BlockSpec((c, 1), lambda i: (0, 0)),               # b2
                pl.BlockSpec((6, 4 * ch, c), lambda i: (0, 0, 0)),    # stacked convT
                pl.BlockSpec((4 * ch, 1), lambda i: (0, 0)),          # bt (x4 phases)
                pl.BlockSpec((1, L), lambda i: (0, 0)),               # pad-col mask
            ],
            out_specs=pl.BlockSpec((1, 4 * ch, L), lambda i: (i, 0, 0)),
            scratch_shapes=[pltpu.VMEM((c, lbuf), jnp.float32)],      # y1/y2 buffer
        ),
        compiler_params=pltpu.CompilerParams(
            dimension_semantics=("parallel",)),
    )(xflat, w1k, b1, w2k, b2, wt6, bt4, colmask)

    # (N, [rp,cp,CH], H*Wq) -> (N, CH, 2H, 2Wq) -> crop to 2W+1 cols (NCHW).
    out = out_flat.reshape(n, 2, 2, ch, h, wq)
    out = jnp.transpose(out, (0, 3, 4, 1, 5, 2)).reshape(n, ch, 2 * h, 2 * wq)
    return out[:, :, :, : 2 * w + 1]


def init_params(key, channels):
    """Deterministic synthetic parameters (PyTorch-default-like uniform init, PyTorch layouts)."""
    c2 = 2 * channels
    ch = channels // 2
    keys = jax.random.split(key, 6)

    def u(k, shape, fan_in):
        bound = 1.0 / np.sqrt(fan_in)
        return jax.random.uniform(k, shape, jnp.float32, -bound, bound)

    return dict(
        w1=u(keys[0], (channels, c2, 3, 3), c2 * 9),           # OIHW
        b1=u(keys[1], (channels,), c2 * 9),
        w2=u(keys[2], (channels, channels, 3, 3), channels * 9),
        b2=u(keys[3], (channels,), channels * 9),
        wt=u(keys[4], (channels, ch, 3, 4), channels * 12),    # ConvTranspose (Cin,Cout,KH,KW)
        bt=u(keys[5], (ch,), channels * 12),
    )


def ref_forward(x_nchw, params):
    """Pure-JAX reference (XLA convs) mirroring the PyTorch module exactly."""
    dn = ("NCHW", "OIHW", "NCHW")
    y = lax.conv_general_dilated(x_nchw, params["w1"], (1, 1), ((1, 1), (1, 1)),
                                 dimension_numbers=dn)
    y = jax.nn.relu(y + params["b1"][None, :, None, None])

    y = lax.conv_general_dilated(y, params["w2"], (1, 1), ((1, 1), (1, 1)),
                                 dimension_numbers=dn)
    y = jax.nn.relu(y + params["b2"][None, :, None, None])

    # ConvTranspose2d(k=(3,4), s=2, p=1, op=1) == dilated conv with flipped kernel.
    wtf = jnp.transpose(params["wt"][:, :, ::-1, ::-1], (1, 0, 2, 3))   # OIHW
    y = lax.conv_general_dilated(y, wtf, (1, 1), ((1, 2), (2, 3)),
                                 lhs_dilation=(2, 2), dimension_numbers=dn)
    y = jax.nn.relu(y + params["bt"][None, :, None, None])
    return y


if __name__ == "__main__":
    channels = 8
    n, h, w = 2, 16, 16

    key = jax.random.PRNGKey(0)
    kx, kp = jax.random.split(key)
    x = jax.random.normal(kx, (n, 2 * channels, h, w), jnp.float32)
    params = init_params(kp, channels)

    fwd = jax.jit(upsample2_forward)
    out = jax.block_until_ready(fwd(x, params))
    ref = jax.block_until_ready(ref_forward(x, params))

    assert out.shape == (n, channels // 2, 2 * h, 2 * w + 1), out.shape
    max_err = float(jnp.max(jnp.abs(out - ref)))
    assert np.isfinite(max_err) and max_err < 1e-3, f"max abs err {max_err}"
    print("KERNEL_OK")
</pallas_src>

<mosaic_0001>
module attributes {stable_mosaic.version = 11 : i64} {
  func.func @kernel(%arg0: i32, %arg1: memref<1x16x308xf32, #tpu.memory_space<vmem>>, %arg2: memref<9x8x16xf32, #tpu.memory_space<vmem>>, %arg3: memref<8x1xf32, #tpu.memory_space<vmem>>, %arg4: memref<9x8x8xf32, #tpu.memory_space<vmem>>, %arg5: memref<8x1xf32, #tpu.memory_space<vmem>>, %arg6: memref<6x16x8xf32, #tpu.memory_space<vmem>>, %arg7: memref<16x1xf32, #tpu.memory_space<vmem>>, %arg8: memref<1x272xf32, #tpu.memory_space<vmem>>, %arg9: memref<1x16x272xf32, #tpu.memory_space<vmem>>, %arg10: memref<8x308xf32, #tpu.memory_space<vmem>>) attributes {dimension_semantics = [#tpu.dimension_semantics<parallel>], iteration_bounds = array<i64: 2>, scalar_prefetch = 0 : i64, scratch_operands = 1 : i64, tpu.core_type = #tpu.core_type<tc>, window_params = [{transform_indices = @transform_0, window_bounds = array<i64: 1, 16, 308>}, {pipeline_mode = #tpu.pipeline_mode<synchronous>, transform_indices = @transform_1, window_bounds = array<i64: 9, 8, 16>}, {pipeline_mode = #tpu.pipeline_mode<synchronous>, transform_indices = @transform_2, window_bounds = array<i64: 8, 1>}, {pipeline_mode = #tpu.pipeline_mode<synchronous>, transform_indices = @transform_3, window_bounds = array<i64: 9, 8, 8>}, {pipeline_mode = #tpu.pipeline_mode<synchronous>, transform_indices = @transform_4, window_bounds = array<i64: 8, 1>}, {pipeline_mode = #tpu.pipeline_mode<synchronous>, transform_indices = @transform_5, window_bounds = array<i64: 6, 16, 8>}, {pipeline_mode = #tpu.pipeline_mode<synchronous>, transform_indices = @transform_6, window_bounds = array<i64: 16, 1>}, {pipeline_mode = #tpu.pipeline_mode<synchronous>, transform_indices = @transform_7, window_bounds = array<i64: 1, 272>}, {transform_indices = @transform_8, window_bounds = array<i64: 1, 16, 272>}]} {
    %c0 = arith.constant 0 : index
    %c0_0 = arith.constant 0 : index
    %0 = vector.load %arg8[%c0, %c0_0] : memref<1x272xf32, #tpu.memory_space<vmem>>, vector<1x272xf32>
    %cst = arith.constant 0.000000e+00 : f32
    %1 = vector.broadcast %cst : f32 to vector<8x18xf32>
    %c0_1 = arith.constant 0 : index
    %c0_2 = arith.constant 0 : index
    %2 = vector.load %arg10[%c0_1, %c0_2] : memref<8x308xf32, #tpu.memory_space<vmem>>, vector<8x18xf32>
    tpu.vector_store %arg10[%c0_1, %c0_2], %1 {strides = array<i32>} : memref<8x308xf32, #tpu.memory_space<vmem>>, vector<8x18xf32>,
    %c0_3 = arith.constant 0 : index
    %c290 = arith.constant 290 : index
    %3 = vector.load %arg10[%c0_3, %c290] : memref<8x308xf32, #tpu.memory_space<vmem>>, vector<8x18xf32>
    tpu.vector_store %arg10[%c0_3, %c290], %1 {strides = array<i32>} : memref<8x308xf32, #tpu.memory_space<vmem>>, vector<8x18xf32>,
    %c0_4 = arith.constant 0 : index
    %c0_5 = arith.constant 0 : index
    %c0_6 = arith.constant 0 : index
    %4 = vector.load %arg2[%c0_4, %c0_5, %c0_6] : memref<9x8x16xf32, #tpu.memory_space<vmem>>, vector<1x8x16xf32>
    %5 = vector.shape_cast %4 : vector<1x8x16xf32> to vector<8x16xf32>
    %c0_7 = arith.constant 0 : index
    %c0_8 = arith.constant 0 : index
    %c0_9 = arith.constant 0 : index
    %6 = vector.load %arg1[%c0_7, %c0_8, %c0_9] : memref<1x16x308xf32, #tpu.memory_space<vmem>>, vector<1x16x272xf32>
    %7 = vector.shape_cast %6 : vector<1x16x272xf32> to vector<16x272xf32>
    %cst_10 = arith.constant dense<0.000000e+00> : vector<8x272xf32>
    %8 = tpu.matmul %5, %7, %cst_10 {dimension_numbers = #tpu.dot_dimension_numbers<[1], [0], [0], [1], [0, 0, 1, 1], [], []>} : vector<8x16xf32>, vector<16x272xf32>, vector<8x272xf32> -> vector<8x272xf32>
    %c1 = arith.constant 1 : index
    %c0_11 = arith.constant 0 : index
    %c0_12 = arith.constant 0 : index
    %9 = vector.load %arg2[%c1, %c0_11, %c0_12] : memref<9x8x16xf32, #tpu.memory_space<vmem>>, vector<1x8x16xf32>
    %10 = vector.shape_cast %9 : vector<1x8x16xf32> to vector<8x16xf32>
    %c0_13 = arith.constant 0 : index
    %c0_14 = arith.constant 0 : index
    %c1_15 = arith.constant 1 : index
    %11 = vector.load %arg1[%c0_13, %c0_14, %c1_15] : memref<1x16x308xf32, #tpu.memory_space<vmem>>, vector<1x16x272xf32>
    %12 = vector.shape_cast %11 : vector<1x16x272xf32> to vector<16x272xf32>
    %cst_16 = arith.constant dense<0.000000e+00> : vector<8x272xf32>
    %13 = tpu.matmul %10, %12, %cst_16 {dimension_numbers = #tpu.dot_dimension_numbers<[1], [0], [0], [1], [0, 0, 1, 1], [], []>} : vector<8x16xf32>, vector<16x272xf32>, vector<8x272xf32> -> vector<8x272xf32>
    %14 = arith.addf %8, %13 : vector<8x272xf32>
    %c2 = arith.constant 2 : index
    %c0_17 = arith.constant 0 : index
    %c0_18 = arith.constant 0 : index
    %15 = vector.load %arg2[%c2, %c0_17, %c0_18] : memref<9x8x16xf32, #tpu.memory_space<vmem>>, vector<1x8x16xf32>
    %16 = vector.shape_cast %15 : vector<1x8x16xf32> to vector<8x16xf32>
    %c0_19 = arith.constant 0 : index
    %c0_20 = arith.constant 0 : index
    %c2_21 = arith.constant 2 : index
    %17 = vector.load %arg1[%c0_19, %c0_20, %c2_21] : memref<1x16x308xf32, #tpu.memory_space<vmem>>, vector<1x16x272xf32>
    %18 = vector.shape_cast %17 : vector<1x16x272xf32> to vector<16x272xf32>
    %cst_22 = arith.constant dense<0.000000e+00> : vector<8x272xf32>
    %19 = tpu.matmul %16, %18, %cst_22 {dimension_numbers = #tpu.dot_dimension_numbers<[1], [0], [0], [1], [0, 0, 1, 1], [], []>} : vector<8x16xf32>, vector<16x272xf32>, vector<8x272xf32> -> vector<8x272xf32>
    %20 = arith.addf %14, %19 : vector<8x272xf32>
    %c3 = arith.constant 3 : index
    %c0_23 = arith.constant 0 : index
    %c0_24 = arith.constant 0 : index
    %21 = vector.load %arg2[%c3, %c0_23, %c0_24] : memref<9x8x16xf32, #tpu.memory_space<vmem>>, vector<1x8x16xf32>
    %22 = vector.shape_cast %21 : vector<1x8x16xf32> to vector<8x16xf32>
    %c0_25 = arith.constant 0 : index
    %c0_26 = arith.constant 0 : index
    %c17 = arith.constant 17 : index
    %23 = vector.load %arg1[%c0_25, %c0_26, %c17] : memref<1x16x308xf32, #tpu.memory_space<vmem>>, vector<1x16x272xf32>
    %24 = vector.shape_cast %23 : vector<1x16x272xf32> to vector<16x272xf32>
    %cst_27 = arith.constant dense<0.000000e+00> : vector<8x272xf32>
    %25 = tpu.matmul %22, %24, %cst_27 {dimension_numbers = #tpu.dot_dimension_numbers<[1], [0], [0], [1], [0, 0, 1, 1], [], []>} : vector<8x16xf32>, vector<16x272xf32>, vector<8x272xf32> -> vector<8x272xf32>
    %26 = arith.addf %20, %25 : vector<8x272xf32>
    %c4 = arith.constant 4 : index
    %c0_28 = arith.constant 0 : index
    %c0_29 = arith.constant 0 : index
    %27 = vector.load %arg2[%c4, %c0_28, %c0_29] : memref<9x8x16xf32, #tpu.memory_space<vmem>>, vector<1x8x16xf32>
    %28 = vector.shape_cast %27 : vector<1x8x16xf32> to vector<8x16xf32>
    %c0_30 = arith.constant 0 : index
    %c0_31 = arith.constant 0 : index
    %c18 = arith.constant 18 : index
    %29 = vector.load %arg1[%c0_30, %c0_31, %c18] : memref<1x16x308xf32, #tpu.memory_space<vmem>>, vector<1x16x272xf32>
    %30 = vector.shape_cast %29 : vector<1x16x272xf32> to vector<16x272xf32>
    %cst_32 = arith.constant dense<0.000000e+00> : vector<8x272xf32>
    %31 = tpu.matmul %28, %30, %cst_32 {dimension_numbers = #tpu.dot_dimension_numbers<[1], [0], [0], [1], [0, 0, 1, 1], [], []>} : vector<8x16xf32>, vector<16x272xf32>, vector<8x272xf32> -> vector<8x272xf32>
    %32 = arith.addf %26, %31 : vector<8x272xf32>
    %c5 = arith.constant 5 : index
    %c0_33 = arith.constant 0 : index
    %c0_34 = arith.constant 0 : index
    %33 = vector.load %arg2[%c5, %c0_33, %c0_34] : memref<9x8x16xf32, #tpu.memory_space<vmem>>, vector<1x8x16xf32>
    %34 = vector.shape_cast %33 : vector<1x8x16xf32> to vector<8x16xf32>
    %c0_35 = arith.constant 0 : index
    %c0_36 = arith.constant 0 : index
    %c19 = arith.constant 19 : index
    %35 = vector.load %arg1[%c0_35, %c0_36, %c19] : memref<1x16x308xf32, #tpu.memory_space<vmem>>, vector<1x16x272xf32>
    %36 = vector.shape_cast %35 : vector<1x16x272xf32> to vector<16x272xf32>
    %cst_37 = arith.constant dense<0.000000e+00> : vector<8x272xf32>
    %37 = tpu.matmul %34, %36, %cst_37 {dimension_numbers = #tpu.dot_dimension_numbers<[1], [0], [0], [1], [0, 0, 1, 1], [], []>} : vector<8x16xf32>, vector<16x272xf32>, vector<8x272xf32> -> vector<8x272xf32>
    %38 = arith.addf %32, %37 : vector<8x272xf32>
    %c6 = arith.constant 6 : index
    %c0_38 = arith.constant 0 : index
    %c0_39 = arith.constant 0 : index
    %39 = vector.load %arg2[%c6, %c0_38, %c0_39] : memref<9x8x16xf32, #tpu.memory_space<vmem>>, vector<1x8x16xf32>
    %40 = vector.shape_cast %39 : vector<1x8x16xf32> to vector<8x16xf32>
    %c0_40 = arith.constant 0 : index
    %c0_41 = arith.constant 0 : index
    %c34 = arith.constant 34 : index
    %41 = vector.load %arg1[%c0_40, %c0_41, %c34] : memref<1x16x308xf32, #tpu.memory_space<vmem>>, vector<1x16x272xf32>
    %42 = vector.shape_cast %41 : vector<1x16x272xf32> to vector<16x272xf32>
    %cst_42 = arith.constant dense<0.000000e+00> : vector<8x272xf32>
    %43 = tpu.matmul %40, %42, %cst_42 {dimension_numbers = #tpu.dot_dimension_numbers<[1], [0], [0], [1], [0, 0, 1, 1], [], []>} : vector<8x16xf32>, vector<16x272xf32>, vector<8x272xf32> -> vector<8x272xf32>
    %44 = arith.addf %38, %43 : vector<8x272xf32>
    %c7 = arith.constant 7 : index
    %c0_43 = arith.constant 0 : index
    %c0_44 = arith.constant 0 : index
    %45 = vector.load %arg2[%c7, %c0_43, %c0_44] : memref<9x8x16xf32, #tpu.memory_space<vmem>>, vector<1x8x16xf32>
    %46 = vector.shape_cast %45 : vector<1x8x16xf32> to vector<8x16xf32>
    %c0_45 = arith.constant 0 : index
    %c0_46 = arith.constant 0 : index
    %c35 = arith.constant 35 : index
    %47 = vector.load %arg1[%c0_45, %c0_46, %c35] : memref<1x16x308xf32, #tpu.memory_space<vmem>>, vector<1x16x272xf32>
    %48 = vector.shape_cast %47 : vector<1x16x272xf32> to vector<16x272xf32>
    %cst_47 = arith.constant dense<0.000000e+00> : vector<8x272xf32>
    %49 = tpu.matmul %46, %48, %cst_47 {dimension_numbers = #tpu.dot_dimension_numbers<[1], [0], [0], [1], [0, 0, 1, 1], [], []>} : vector<8x16xf32>, vector<16x272xf32>, vector<8x272xf32> -> vector<8x272xf32>
    %50 = arith.addf %44, %49 : vector<8x272xf32>
    %c8 = arith.constant 8 : index
    %c0_48 = arith.constant 0 : index
    %c0_49 = arith.constant 0 : index
    %51 = vector.load %arg2[%c8, %c0_48, %c0_49] : memref<9x8x16xf32, #tpu.memory_space<vmem>>, vector<1x8x16xf32>
    %52 = vector.shape_cast %51 : vector<1x8x16xf32> to vector<8x16xf32>
    %c0_50 = arith.constant 0 : index
    %c0_51 = arith.constant 0 : index
    %c36 = arith.constant 36 : index
    %53 = vector.load %arg1[%c0_50, %c0_51, %c36] : memref<1x16x308xf32, #tpu.memory_space<vmem>>, vector<1x16x272xf32>
    %54 = vector.shape_cast %53 : vector<1x16x272xf32> to vector<16x272xf32>
    %cst_52 = arith.constant dense<0.000000e+00> : vector<8x272xf32>
    %55 = tpu.matmul %52, %54, %cst_52 {dimension_numbers = #tpu.dot_dimension_numbers<[1], [0], [0], [1], [0, 0, 1, 1], [], []>} : vector<8x16xf32>, vector<16x272xf32>, vector<8x272xf32> -> vector<8x272xf32>
    %56 = arith.addf %50, %55 : vector<8x272xf32>
    %c0_53 = arith.constant 0 : index
    %c0_54 = arith.constant 0 : index
    %57 = vector.load %arg3[%c0_53, %c0_54] : memref<8x1xf32, #tpu.memory_space<vmem>>, vector<8x1xf32>
    %58 = vector.broadcast %57 : vector<8x1xf32> to vector<8x272xf32>
    %59 = arith.addf %56, %58 : vector<8x272xf32>
    %cst_55 = arith.constant 0.000000e+00 : f32
    %60 = vector.broadcast %cst_55 : f32 to vector<8x272xf32>
    %61 = arith.maximumf %59, %60 : vector<8x272xf32>
    %62 = vector.broadcast %0 : vector<1x272xf32> to vector<8x272xf32>
    %63 = arith.mulf %61, %62 : vector<8x272xf32>
    %c0_56 = arith.constant 0 : index
    %c18_57 = arith.constant 18 : index
    %64 = vector.load %arg10[%c0_56, %c18_57] : memref<8x308xf32, #tpu.memory_space<vmem>>, vector<8x272xf32>
    tpu.vector_store %arg10[%c0_56, %c18_57], %63 {strides = array<i32>} : memref<8x308xf32, #tpu.memory_space<vmem>>, vector<8x272xf32>,
    %c0_58 = arith.constant 0 : index
    %c0_59 = arith.constant 0 : index
    %c0_60 = arith.constant 0 : index
    %65 = vector.load %arg4[%c0_58, %c0_59, %c0_60] : memref<9x8x8xf32, #tpu.memory_space<vmem>>, vector<1x8x8xf32>
    %66 = vector.shape_cast %65 : vector<1x8x8xf32> to vector<8x8xf32>
    %c0_61 = arith.constant 0 : index
    %c0_62 = arith.constant 0 : index
    %67 = vector.load %arg10[%c0_61, %c0_62] : memref<8x308xf32, #tpu.memory_space<vmem>>, vector<8x272xf32>
    %cst_63 = arith.constant dense<0.000000e+00> : vector<8x272xf32>
    %68 = tpu.matmul %66, %67, %cst_63 {dimension_numbers = #tpu.dot_dimension_numbers<[1], [0], [0], [1], [0, 0, 1, 1], [], []>} : vector<8x8xf32>, vector<8x272xf32>, vector<8x272xf32> -> vector<8x272xf32>
    %c1_64 = arith.constant 1 : index
    %c0_65 = arith.constant 0 : index
    %c0_66 = arith.constant 0 : index
    %69 = vector.load %arg4[%c1_64, %c0_65, %c0_66] : memref<9x8x8xf32, #tpu.memory_space<vmem>>, vector<1x8x8xf32>
    %70 = vector.shape_cast %69 : vector<1x8x8xf32> to vector<8x8xf32>
    %c0_67 = arith.constant 0 : index
    %c1_68 = arith.constant 1 : index
    %71 = vector.load %arg10[%c0_67, %c1_68] : memref<8x308xf32, #tpu.memory_space<vmem>>, vector<8x272xf32>
    %cst_69 = arith.constant dense<0.000000e+00> : vector<8x272xf32>
    %72 = tpu.matmul %70, %71, %cst_69 {dimension_numbers = #tpu.dot_dimension_numbers<[1], [0], [0], [1], [0, 0, 1, 1], [], []>} : vector<8x8xf32>, vector<8x272xf32>, vector<8x272xf32> -> vector<8x272xf32>
    %73 = arith.addf %68, %72 : vector<8x272xf32>
    %c2_70 = arith.constant 2 : index
    %c0_71 = arith.constant 0 : index
    %c0_72 = arith.constant 0 : index
    %74 = vector.load %arg4[%c2_70, %c0_71, %c0_72] : memref<9x8x8xf32, #tpu.memory_space<vmem>>, vector<1x8x8xf32>
    %75 = vector.shape_cast %74 : vector<1x8x8xf32> to vector<8x8xf32>
    %c0_73 = arith.constant 0 : index
    %c2_74 = arith.constant 2 : index
    %76 = vector.load %arg10[%c0_73, %c2_74] : memref<8x308xf32, #tpu.memory_space<vmem>>, vector<8x272xf32>
    %cst_75 = arith.constant dense<0.000000e+00> : vector<8x272xf32>
    %77 = tpu.matmul %75, %76, %cst_75 {dimension_numbers = #tpu.dot_dimension_numbers<[1], [0], [0], [1], [0, 0, 1, 1], [], []>} : vector<8x8xf32>, vector<8x272xf32>, vector<8x272xf32> -> vector<8x272xf32>
    %78 = arith.addf %73, %77 : vector<8x272xf32>
    %c3_76 = arith.constant 3 : index
    %c0_77 = arith.constant 0 : index
    %c0_78 = arith.constant 0 : index
    %79 = vector.load %arg4[%c3_76, %c0_77, %c0_78] : memref<9x8x8xf32, #tpu.memory_space<vmem>>, vector<1x8x8xf32>
    %80 = vector.shape_cast %79 : vector<1x8x8xf32> to vector<8x8xf32>
    %c0_79 = arith.constant 0 : index
    %c17_80 = arith.constant 17 : index
    %81 = vector.load %arg10[%c0_79, %c17_80] : memref<8x308xf32, #tpu.memory_space<vmem>>, vector<8x272xf32>
    %cst_81 = arith.constant dense<0.000000e+00> : vector<8x272xf32>
    %82 = tpu.matmul %80, %81, %cst_81 {dimension_numbers = #tpu.dot_dimension_numbers<[1], [0], [0], [1], [0, 0, 1, 1], [], []>} : vector<8x8xf32>, vector<8x272xf32>, vector<8x272xf32> -> vector<8x272xf32>
    %83 = arith.addf %78, %82 : vector<8x272xf32>
    %c4_82 = arith.constant 4 : index
    %c0_83 = arith.constant 0 : index
    %c0_84 = arith.constant 0 : index
    %84 = vector.load %arg4[%c4_82, %c0_83, %c0_84] : memref<9x8x8xf32, #tpu.memory_space<vmem>>, vector<1x8x8xf32>
    %85 = vector.shape_cast %84 : vector<1x8x8xf32> to vector<8x8xf32>
    %c0_85 = arith.constant 0 : index
    %c18_86 = arith.constant 18 : index
    %86 = vector.load %arg10[%c0_85, %c18_86] : memref<8x308xf32, #tpu.memory_space<vmem>>, vector<8x272xf32>
    %cst_87 = arith.constant dense<0.000000e+00> : vector<8x272xf32>
    %87 = tpu.matmul %85, %86, %cst_87 {dimension_numbers = #tpu.dot_dimension_numbers<[1], [0], [0], [1], [0, 0, 1, 1], [], []>} : vector<8x8xf32>, vector<8x272xf32>, vector<8x272xf32> -> vector<8x272xf32>
    %88 = arith.addf %83, %87 : vector<8x272xf32>
    %c5_88 = arith.constant 5 : index
    %c0_89 = arith.constant 0 : index
    %c0_90 = arith.constant 0 : index
    %89 = vector.load %arg4[%c5_88, %c0_89, %c0_90] : memref<9x8x8xf32, #tpu.memory_space<vmem>>, vector<1x8x8xf32>
    %90 = vector.shape_cast %89 : vector<1x8x8xf32> to vector<8x8xf32>
    %c0_91 = arith.constant 0 : index
    %c19_92 = arith.constant 19 : index
    %91 = vector.load %arg10[%c0_91, %c19_92] : memref<8x308xf32, #tpu.memory_space<vmem>>, vector<8x272xf32>
    %cst_93 = arith.constant dense<0.000000e+00> : vector<8x272xf32>
    %92 = tpu.matmul %90, %91, %cst_93 {dimension_numbers = #tpu.dot_dimension_numbers<[1], [0], [0], [1], [0, 0, 1, 1], [], []>} : vector<8x8xf32>, vector<8x272xf32>, vector<8x272xf32> -> vector<8x272xf32>
    %93 = arith.addf %88, %92 : vector<8x272xf32>
    %c6_94 = arith.constant 6 : index
    %c0_95 = arith.constant 0 : index
    %c0_96 = arith.constant 0 : index
    %94 = vector.load %arg4[%c6_94, %c0_95, %c0_96] : memref<9x8x8xf32, #tpu.memory_space<vmem>>, vector<1x8x8xf32>
    %95 = vector.shape_cast %94 : vector<1x8x8xf32> to vector<8x8xf32>
    %c0_97 = arith.constant 0 : index
    %c34_98 = arith.constant 34 : index
    %96 = vector.load %arg10[%c0_97, %c34_98] : memref<8x308xf32, #tpu.memory_space<vmem>>, vector<8x272xf32>
    %cst_99 = arith.constant dense<0.000000e+00> : vector<8x272xf32>
    %97 = tpu.matmul %95, %96, %cst_99 {dimension_numbers = #tpu.dot_dimension_numbers<[1], [0], [0], [1], [0, 0, 1, 1], [], []>} : vector<8x8xf32>, vector<8x272xf32>, vector<8x272xf32> -> vector<8x272xf32>
    %98 = arith.addf %93, %97 : vector<8x272xf32>
    %c7_100 = arith.constant 7 : index
    %c0_101 = arith.constant 0 : index
    %c0_102 = arith.constant 0 : index
    %99 = vector.load %arg4[%c7_100, %c0_101, %c0_102] : memref<9x8x8xf32, #tpu.memory_space<vmem>>, vector<1x8x8xf32>
    %100 = vector.shape_cast %99 : vector<1x8x8xf32> to vector<8x8xf32>
    %c0_103 = arith.constant 0 : index
    %c35_104 = arith.constant 35 : index
    %101 = vector.load %arg10[%c0_103, %c35_104] : memref<8x308xf32, #tpu.memory_space<vmem>>, vector<8x272xf32>
    %cst_105 = arith.constant dense<0.000000e+00> : vector<8x272xf32>
    %102 = tpu.matmul %100, %101, %cst_105 {dimension_numbers = #tpu.dot_dimension_numbers<[1], [0], [0], [1], [0, 0, 1, 1], [], []>} : vector<8x8xf32>, vector<8x272xf32>, vector<8x272xf32> -> vector<8x272xf32>
    %103 = arith.addf %98, %102 : vector<8x272xf32>
    %c8_106 = arith.constant 8 : index
    %c0_107 = arith.constant 0 : index
    %c0_108 = arith.constant 0 : index
    %104 = vector.load %arg4[%c8_106, %c0_107, %c0_108] : memref<9x8x8xf32, #tpu.memory_space<vmem>>, vector<1x8x8xf32>
    %105 = vector.shape_cast %104 : vector<1x8x8xf32> to vector<8x8xf32>
    %c0_109 = arith.constant 0 : index
    %c36_110 = arith.constant 36 : index
    %106 = vector.load %arg10[%c0_109, %c36_110] : memref<8x308xf32, #tpu.memory_space<vmem>>, vector<8x272xf32>
    %cst_111 = arith.constant dense<0.000000e+00> : vector<8x272xf32>
    %107 = tpu.matmul %105, %106, %cst_111 {dimension_numbers = #tpu.dot_dimension_numbers<[1], [0], [0], [1], [0, 0, 1, 1], [], []>} : vector<8x8xf32>, vector<8x272xf32>, vector<8x272xf32> -> vector<8x272xf32>
    %108 = arith.addf %103, %107 : vector<8x272xf32>
    %c0_112 = arith.constant 0 : index
    %c0_113 = arith.constant 0 : index
    %109 = vector.load %arg5[%c0_112, %c0_113] : memref<8x1xf32, #tpu.memory_space<vmem>>, vector<8x1xf32>
    %110 = vector.broadcast %109 : vector<8x1xf32> to vector<8x272xf32>
    %111 = arith.addf %108, %110 : vector<8x272xf32>
    %cst_114 = arith.constant 0.000000e+00 : f32
    %112 = vector.broadcast %cst_114 : f32 to vector<8x272xf32>
    %113 = arith.maximumf %111, %112 : vector<8x272xf32>
    %114 = vector.broadcast %0 : vector<1x272xf32> to vector<8x272xf32>
    %115 = arith.mulf %113, %114 : vector<8x272xf32>
    %c0_115 = arith.constant 0 : index
    %c18_116 = arith.constant 18 : index
    %116 = vector.load %arg10[%c0_115, %c18_116] : memref<8x308xf32, #tpu.memory_space<vmem>>, vector<8x272xf32>
    tpu.vector_store %arg10[%c0_115, %c18_116], %115 {strides = array<i32>} : memref<8x308xf32, #tpu.memory_space<vmem>>, vector<8x272xf32>,
    %c0_117 = arith.constant 0 : index
    %c0_118 = arith.constant 0 : index
    %c0_119 = arith.constant 0 : index
    %117 = vector.load %arg6[%c0_117, %c0_118, %c0_119] : memref<6x16x8xf32, #tpu.memory_space<vmem>>, vector<1x16x8xf32>
    %118 = vector.shape_cast %117 : vector<1x16x8xf32> to vector<16x8xf32>
    %c0_120 = arith.constant 0 : index
    %c17_121 = arith.constant 17 : index
    %119 = vector.load %arg10[%c0_120, %c17_121] : memref<8x308xf32, #tpu.memory_space<vmem>>, vector<8x272xf32>
    %cst_122 = arith.constant dense<0.000000e+00> : vector<16x272xf32>
    %120 = tpu.matmul %118, %119, %cst_122 {dimension_numbers = #tpu.dot_dimension_numbers<[1], [0], [0], [1], [0, 0, 1, 1], [], []>} : vector<16x8xf32>, vector<8x272xf32>, vector<16x272xf32> -> vector<16x272xf32>
    %c1_123 = arith.constant 1 : index
    %c0_124 = arith.constant 0 : index
    %c0_125 = arith.constant 0 : index
    %121 = vector.load %arg6[%c1_123, %c0_124, %c0_125] : memref<6x16x8xf32, #tpu.memory_space<vmem>>, vector<1x16x8xf32>
    %122 = vector.shape_cast %121 : vector<1x16x8xf32> to vector<16x8xf32>
    %c0_126 = arith.constant 0 : index
    %c18_127 = arith.constant 18 : index
    %123 = vector.load %arg10[%c0_126, %c18_127] : memref<8x308xf32, #tpu.memory_space<vmem>>, vector<8x272xf32>
    %cst_128 = arith.constant dense<0.000000e+00> : vector<16x272xf32>
    %124 = tpu.matmul %122, %123, %cst_128 {dimension_numbers = #tpu.dot_dimension_numbers<[1], [0], [0], [1], [0, 0, 1, 1], [], []>} : vector<16x8xf32>, vector<8x272xf32>, vector<16x272xf32> -> vector<16x272xf32>
    %125 = arith.addf %120, %124 : vector<16x272xf32>
    %c2_129 = arith.constant 2 : index
    %c0_130 = arith.constant 0 : index
    %c0_131 = arith.constant 0 : index
    %126 = vector.load %arg6[%c2_129, %c0_130, %c0_131] : memref<6x16x8xf32, #tpu.memory_space<vmem>>, vector<1x16x8xf32>
    %127 = vector.shape_cast %126 : vector<1x16x8xf32> to vector<16x8xf32>
    %c0_132 = arith.constant 0 : index
    %c19_133 = arith.constant 19 : index
    %128 = vector.load %arg10[%c0_132, %c19_133] : memref<8x308xf32, #tpu.memory_space<vmem>>, vector<8x272xf32>
    %cst_134 = arith.constant dense<0.000000e+00> : vector<16x272xf32>
    %129 = tpu.matmul %127, %128, %cst_134 {dimension_numbers = #tpu.dot_dimension_numbers<[1], [0], [0], [1], [0, 0, 1, 1], [], []>} : vector<16x8xf32>, vector<8x272xf32>, vector<16x272xf32> -> vector<16x272xf32>
    %130 = arith.addf %125, %129 : vector<16x272xf32>
    %c3_135 = arith.constant 3 : index
    %c0_136 = arith.constant 0 : index
    %c0_137 = arith.constant 0 : index
    %131 = vector.load %arg6[%c3_135, %c0_136, %c0_137] : memref<6x16x8xf32, #tpu.memory_space<vmem>>, vector<1x16x8xf32>
    %132 = vector.shape_cast %131 : vector<1x16x8xf32> to vector<16x8xf32>
    %c0_138 = arith.constant 0 : index
    %c34_139 = arith.constant 34 : index
    %133 = vector.load %arg10[%c0_138, %c34_139] : memref<8x308xf32, #tpu.memory_space<vmem>>, vector<8x272xf32>
    %cst_140 = arith.constant dense<0.000000e+00> : vector<16x272xf32>
    %134 = tpu.matmul %132, %133, %cst_140 {dimension_numbers = #tpu.dot_dimension_numbers<[1], [0], [0], [1], [0, 0, 1, 1], [], []>} : vector<16x8xf32>, vector<8x272xf32>, vector<16x272xf32> -> vector<16x272xf32>
    %135 = arith.addf %130, %134 : vector<16x272xf32>
    %c4_141 = arith.constant 4 : index
    %c0_142 = arith.constant 0 : index
    %c0_143 = arith.constant 0 : index
    %136 = vector.load %arg6[%c4_141, %c0_142, %c0_143] : memref<6x16x8xf32, #tpu.memory_space<vmem>>, vector<1x16x8xf32>
    %137 = vector.shape_cast %136 : vector<1x16x8xf32> to vector<16x8xf32>
    %c0_144 = arith.constant 0 : index
    %c35_145 = arith.constant 35 : index
    %138 = vector.load %arg10[%c0_144, %c35_145] : memref<8x308xf32, #tpu.memory_space<vmem>>, vector<8x272xf32>
    %cst_146 = arith.constant dense<0.000000e+00> : vector<16x272xf32>
    %139 = tpu.matmul %137, %138, %cst_146 {dimension_numbers = #tpu.dot_dimension_numbers<[1], [0], [0], [1], [0, 0, 1, 1], [], []>} : vector<16x8xf32>, vector<8x272xf32>, vector<16x272xf32> -> vector<16x272xf32>
    %140 = arith.addf %135, %139 : vector<16x272xf32>
    %c5_147 = arith.constant 5 : index
    %c0_148 = arith.constant 0 : index
    %c0_149 = arith.constant 0 : index
    %141 = vector.load %arg6[%c5_147, %c0_148, %c0_149] : memref<6x16x8xf32, #tpu.memory_space<vmem>>, vector<1x16x8xf32>
    %142 = vector.shape_cast %141 : vector<1x16x8xf32> to vector<16x8xf32>
    %c0_150 = arith.constant 0 : index
    %c36_151 = arith.constant 36 : index
    %143 = vector.load %arg10[%c0_150, %c36_151] : memref<8x308xf32, #tpu.memory_space<vmem>>, vector<8x272xf32>
    %cst_152 = arith.constant dense<0.000000e+00> : vector<16x272xf32>
    %144 = tpu.matmul %142, %143, %cst_152 {dimension_numbers = #tpu.dot_dimension_numbers<[1], [0], [0], [1], [0, 0, 1, 1], [], []>} : vector<16x8xf32>, vector<8x272xf32>, vector<16x272xf32> -> vector<16x272xf32>
    %145 = arith.addf %140, %144 : vector<16x272xf32>
    %c0_153 = arith.constant 0 : index
    %c0_154 = arith.constant 0 : index
    %146 = vector.load %arg7[%c0_153, %c0_154] : memref<16x1xf32, #tpu.memory_space<vmem>>, vector<16x1xf32>
    %147 = vector.broadcast %146 : vector<16x1xf32> to vector<16x272xf32>
    %148 = arith.addf %145, %147 : vector<16x272xf32>
    %cst_155 = arith.constant 0.000000e+00 : f32
    %149 = vector.broadcast %cst_155 : f32 to vector<16x272xf32>
    %150 = arith.maximumf %148, %149 : vector<16x272xf32>
    %c0_156 = arith.constant 0 : index
    %c0_157 = arith.constant 0 : index
    %c0_158 = arith.constant 0 : index
    %151 = vector.load %arg9[%c0_156, %c0_157, %c0_158] : memref<1x16x272xf32, #tpu.memory_space<vmem>>, vector<1x16x272xf32>
    %152 = vector.shape_cast %151 : vector<1x16x272xf32> to vector<16x272xf32>
    %153 = vector.shape_cast %150 : vector<16x272xf32> to vector<1x16x272xf32>
    tpu.vector_store %arg9[%c0_156, %c0_157, %c0_158], %153 {strides = array<i32>} : memref<1x16x272xf32, #tpu.memory_space<vmem>>, vector<1x16x272xf32>,
    return
  }
  func.func @transform_0(%arg0: i32) -> (i32, i32, i32) {
    %c0_i32 = arith.constant 0 : i32
    %c0_i32_0 = arith.constant 0 : i32
    %c0_i32_1 = arith.constant 0 : i32
    return %arg0, %c0_i32, %c0_i32_0 : i32, i32, i32
  }
  func.func @transform_1(%arg0: i32) -> (i32, i32, i32) {
    %c0_i32 = arith.constant 0 : i32
    %c0_i32_0 = arith.constant 0 : i32
    %c0_i32_1 = arith.constant 0 : i32
    %c0_i32_2 = arith.constant 0 : i32
    return %c0_i32, %c0_i32_0, %c0_i32_1 : i32, i32, i32
  }
  func.func @transform_2(%arg0: i32) -> (i32, i32) {
    %c0_i32 = arith.constant 0 : i32
    %c0_i32_0 = arith.constant 0 : i32
    %c0_i32_1 = arith.constant 0 : i32
    return %c0_i32, %c0_i32_0 : i32, i32
  }
  func.func @transform_3(%arg0: i32) -> (i32, i32, i32) {
    %c0_i32 = arith.constant 0 : i32
    %c0_i32_0 = arith.constant 0 : i32
    %c0_i32_1 = arith.constant 0 : i32
    %c0_i32_2 = arith.constant 0 : i32
    return %c0_i32, %c0_i32_0, %c0_i32_1 : i32, i32, i32
  }
  func.func @transform_4(%arg0: i32) -> (i32, i32) {
    %c0_i32 = arith.constant 0 : i32
    %c0_i32_0 = arith.constant 0 : i32
    %c0_i32_1 = arith.constant 0 : i32
    return %c0_i32, %c0_i32_0 : i32, i32
  }
  func.func @transform_5(%arg0: i32) -> (i32, i32, i32) {
    %c0_i32 = arith.constant 0 : i32
    %c0_i32_0 = arith.constant 0 : i32
    %c0_i32_1 = arith.constant 0 : i32
    %c0_i32_2 = arith.constant 0 : i32
    return %c0_i32, %c0_i32_0, %c0_i32_1 : i32, i32, i32
  }
  func.func @transform_6(%arg0: i32) -> (i32, i32) {
    %c0_i32 = arith.constant 0 : i32
    %c0_i32_0 = arith.constant 0 : i32
    %c0_i32_1 = arith.constant 0 : i32
    return %c0_i32, %c0_i32_0 : i32, i32
  }
  func.func @transform_7(%arg0: i32) -> (i32, i32) {
    %c0_i32 = arith.constant 0 : i32
    %c0_i32_0 = arith.constant 0 : i32
    %c0_i32_1 = arith.constant 0 : i32
    return %c0_i32, %c0_i32_0 : i32, i32
  }
  func.func @transform_8(%arg0: i32) -> (i32, i32, i32) {
    %c0_i32 = arith.constant 0 : i32
    %c0_i32_0 = arith.constant 0 : i32
    %c0_i32_1 = arith.constant 0 : i32
    return %arg0, %c0_i32, %c0_i32_0 : i32, i32, i32
  }
}

</mosaic_0001>

<bundles_post_ra>
// kernel: tile.6
= control target key start
LH: loop header
LB: loop body
LE: loop exit
PB: predicated region body
PF: predicated region fallthrough
CT: control target
= control target key end

     0   :  { %2 = vsyncpa [#allocation1], 0  ;;  %s44_s6 = smov [#allocation0]   ;;  %s70_s0 = inlined_call_operand.hbm [shape: f32[4], index: 0, kind: input, shape index: {}]   ;;  %s71_s1 = inlined_call_operand.vmem [shape: f32[4,1,1,4], index: 1, kind: output, shape index: {}]  }
   0x1   :  { %s9_s7 = sshll.u32 %s44_s6, 4  ;;  %s20_s10 = scalar_lea.hbm %s70_s0, 16  ;;  %s10_s7 = int_to_ptr.vmem [resolvable:$true] %s9_s7 }
   0x2   :  { %p21_p0 = scmp.ne.s32.totalorder %s70_s0, %s20_s10  ;;  %p24_p1 = scmp.lt.u32.totalorder %s20_s10, %s70_s0 }
   0x4   :  { %p26_p2 = pnand %p24_p1, %p21_p0 }
   0x6   :  { %29 = shalt.err (!%p26_p2)
}
   0x7   :  { %s30_s15 = scalar_lea.vmem %s10_s7, 16  ;;  %s34_s16 = scalar_lea.vmem %s10_s7, 32 }
   0x8   :  { %p31_p3 = scmp.ne.s32.totalorder %s10_s7, %s30_s15  ;;  %p35_p4 = scmp.lt.s32.totalorder %s10_s7, %s10_s7 }
   0x9   :  { %p36_p5 = scmp.lt.s32.totalorder %s34_s16, %s30_s15 }
   0xb   :  { %p37_p6 = por %p36_p5, %p35_p4 }
   0xd   :  { %p38_p7 = pnand %p37_p6, %p31_p3 }
   0xf   :  { %41 = shalt.err (!%p38_p7)
}
  0x10   :  { %12 = dma.hbm_to_vmem [thread:$0]  %s70_s0, 16, %s10_s7, [#allocation1]  }
  0x11   :  { %42 = dma.done.wait [#allocation1], 16  }
  0x12   :  { %43 = vsyncadd [#allocation1], 4294967280  ;;  %v16_v0 = vld [vmem:[#allocation0] ss:$0 sm:$0xff] }
  0x13   :  { %17 = vst [vmem:[%s71_s1] sm:$0xf] %v16_v0 }
  0x14   :  { %18 = vsyncpa [#allocation1], 1 }

// kernel: tile.0
= control target key start
LH: loop header
LB: loop body
LE: loop exit
PB: predicated region body
PF: predicated region fallthrough
CT: control target
= control target key end

     0   :  { %s34_s8 = smov 125   ;;  %vm7_vm0 = vcmask 7168   ;;  %s35_s11 = smov 126   ;;  %s61_s0 = inlined_call_operand.vmem [shape: f32[4,1,1,4], index: 0, kind: input, shape index: {}]   ;;  %s62_s1 = inlined_call_operand.vmem [shape: f32[16,1], index: 1, kind: output, shape index: {}]  }
   0x1   :  { %v4_v0 = vld [vmem:[%s61_s0] sm:$0xf]  ;;  %s33_s0 = smov 127  }
   0x2   :  { %5 = vst [vmem:[#allocation0] sm:$0xf] %v4_v0 }
   0x9   :  { %v9_v1 = vld [vmem:[#allocation0] sm:$0xf]  }
   0xa   :  { %v21_v2 = vld [vmem:[#allocation0] sm:$0xf]   ;;  %10 = vrot.lane.b32.xlu0 %v9_v1, %s33_s0 }
   0xb   :  { %22 = vrot.lane.b32.xlu1 %v21_v2, %s34_s8  ;;  %v6_v3 = vld [vmem:[#allocation0] sm:$0xf]  }
   0xc   :  { %v15_v4 = vld [vmem:[#allocation0] sm:$0xf]   ;;  %8 = vst.msk [vmem:[%s62_s1] ss:$4 sm:$0xf] %vm7_vm0, %v6_v3  }
   0xe   :  { %16 = vrot.lane.b32.xlu0 %v15_v4, %s35_s11 }
  0x7c   :  { %v11_v5 = vpop.permute.xlu0 %10  }
  0x7d   :  { %v23_v6 = vpop.permute.xlu1 %22   ;;  %27 = vst.msk [vmem:[%s62_s1 + $0x1] ss:$4 sm:$0xf] %vm7_vm0, %v11_v5  }
  0x7e   :  { %29 = vst.msk [vmem:[%s62_s1 + $0x3] ss:$4 sm:$0xf] %vm7_vm0, %v23_v6  }
  0x80   :  { %v17_v7 = vpop.permute.xlu0 %16  }
  0x81   :  { %28 = vst.msk [vmem:[%s62_s1 + $0x2] ss:$4 sm:$0xf] %vm7_vm0, %v17_v7  }

// kernel: upsample2_forward.1
= control target key start
LH: loop header
LB: loop body
LE: loop exit
PB: predicated region body
PF: predicated region fallthrough
CT: control target
= control target key end

     0   :  { %s5130_s27 = smov 0   ;;  %s5671_s0 = inlined_call_operand.vmem [shape: f32[2,16,308], index: 0, kind: input, shape index: {}]   ;;  %s5672_s1 = inlined_call_operand.vmem [shape: f32[9,8,16], index: 1, kind: input, shape index: {}]   ;;  %s5673_s2 = inlined_call_operand.vmem [shape: f32[8,1], index: 2, kind: input, shape index: {}]   ;;  %s5674_s3 = inlined_call_operand.vmem [shape: f32[9,8,8], index: 3, kind: input, shape index: {}]   ;;  %s5675_s4 = inlined_call_operand.vmem [shape: f32[8,1], index: 4, kind: input, shape index: {}]   ;;  %s5676_s5 = inlined_call_operand.vmem [shape: f32[6,16,8], index: 5, kind: input, shape index: {}]   ;;  %s5677_s6 = inlined_call_operand.vmem [shape: f32[16,1], index: 6, kind: input, shape index: {}]   ;;  %s5678_s7 = inlined_call_operand.vmem [shape: f32[1,272], index: 7, kind: input, shape index: {}]   ;;  %s5679_s8 = inlined_call_operand.vmem [shape: f32[2,16,272], index: 8, kind: output, shape index: {}]  }
   0x1 LB: > { %s4499_s28 = sadd.s32 4294967295, %s5070_s27   ;;  %p4503_p0 = scmp.ge.s32.totalorder %s5070_s27, 1  ;;  %s5070_s27 = sphi %s5130_s27, %s18_s27  }
   0x2   : > { %p262_p1 = scmp.lt.s32.totalorder %s5070_s27, 3 }
   0x4   : > { %p263_p2 = pnand %p4503_p0, %p262_p1 }
   0x5   : > { %p296_p3 = scmp.lt.s32.totalorder (!%p263_p2), %s4499_s28, 1  ;;  %v5072_v0 = vmov (!%p263_p2), 0.0   ;;  %s5073_s11 = smov (!%p263_p2), 126   ;;  %v5161_v12 = vld [vmem:[%s5672_s1] sm:$0xff] (!%p263_p2)  ;;  %vm349_vm0 = vcmask (!%p263_p2), 130048   ;;  %v5081_v15 = vmov (!%p263_p2), 0  }
   0x6   : > { %266 = sbr.rel (%p263_p2) target bundleno = 1456 (0x5b0), region = 52  ;;  %561 = vmatprep.mubr.f32.mxu0 (!%p263_p2), %v5072_v0  ;;  %417 = vmatprep.mubr.f32.mxu1 (!%p263_p2), %v5072_v0  ;;  %s5074_s12 = smov (!%p263_p2), 111   ;;  %v1842_v14 = vld [vmem:[%s5673_s2] sm:$0xff] (!%p263_p2)  ;;  %vm652_vm1 = vcmask (!%p263_p2), 1031168   ;;  %vm824_vm2 = vcmask (!%p263_p2), 908288   ;;  %v5218_v40 = vld [vmem:[%s5672_s1 + $0x10] sm:$0xff] (!%p263_p2) }
   0x7   : > { %s5075_s15 = smov (!%p263_p2), 127   ;;  %s5076_s16 = smov (!%p263_p2), 110   ;;  %5062 = vset.pattern.permute.xlu0 (!%p263_p2), %v5081_v15  ;;  %5063 = vset.pattern.permute.xlu1 (!%p263_p2), %v5081_v15  ;;  %vm338_vm3 = vcmask (!%p263_p2), 1039360   ;;  %vm996_vm4 = vcmask (!%p263_p2), 900096   ;;  %vm1168_vm5 = vcmask (!%p263_p2), 891904   ;;  %vm5083_vm6 = vmmov (!%p263_p2), 0  }
   0x8   : > { %s5077_s17 = smov (!%p263_p2), 109   ;;  %s5078_s18 = smov (!%p263_p2), 94   ;;  %vm1340_vm7 = vcmask (!%p263_p2), 769024   ;;  %vm1512_vm8 = vcmask (!%p263_p2), 760832   ;;  %vm1684_vm9 = vcmask (!%p263_p2), 752640   ;;  %vm307_vm10 = vcmask (!%p263_p2), 146432  }
   0x9   : > { %s5079_s19 = smov (!%p263_p2), 93   ;;  %s5080_s20 = smov (!%p263_p2), 92   ;;  %308 = vst.msk [vmem:[#allocation2] sm:$0xff] (!%p263_p2), %vm307_vm10, %v5072_v0  ;;  %vm309_vm11 = vcmask (!%p263_p2), 425232   ;;  %vm1887_vm12 = vcmask (!%p263_p2), 1047696   ;;  %vm1890_vm13 = vcmask (!%p263_p2), 277504  }
   0xa   : > { %310 = vst.msk [vmem:[#allocation2 + $0x10] sm:$0xff] (!%p263_p2), %vm309_vm11, %v5072_v0  ;;  %s5084_s13 = smov (!%p263_p2), 18   ;;  %vm1912_vm14 = vcmask (!%p263_p2), 64512  }
   0xd   : > { %s5681_s28 = smov (!%p296_p3, %s4499_s28), 1 }
   0xe   : > { %s4920_s29 = smul.u32 48, %s5681_s28 }
  0x10   : > { %s300_s10 = scalar_lea.vmem %s5671_s0, %s4920_s29 }
  0x11   : > { %v313_v1 = vld [vmem:[%s300_s10 + $0x8] sm:$0xff]  ;;  %v5148_v2 = vld [vmem:[%s300_s10 + $0x10] sm:$0xff]  ;;  %v312_v3 = vld [vmem:[%s300_s10] sm:$0xff] }
  0x12   : > { %v4942_v4 = vpack.i.bf16 %v5148_v2, %v313_v1  ;;  %v315_v5 = vld [vmem:[%s300_s10 + $0x18] sm:$0xff]  ;;  %v316_v6 = vld [vmem:[%s300_s10 + $0x20] sm:$0xff]  ;;  %v5151_v7 = vld [vmem:[%s300_s10 + $0x28] sm:$0xff] }
  0x13   : > { %v4952_v8 = vpack.i.bf16 %v315_v5, %v312_v3  ;;  %v4947_v9 = vpack.i.bf16 %v5151_v7, %v316_v6  ;;  %v4802_v10 = vpack.c.bf16 %v316_v6, %v313_v1  ;;  %v4804_v11 = vpack.c.bf16 %v315_v5, %v312_v3  ;;  %v5242_v1 = vld [vmem:[%s5672_s1 + $0x18] sm:$0xff] }
  0x14   : > { %4943 = vrot.lane.b32.xlu0 %v4942_v4, %s5073_s11  ;;  %v4807_v13 = vpack.c.bf16 %v5151_v7, %v5148_v2 }
  0x15   : > { %4953 = vrot.lane.b32.xlu1 %v4952_v8, %s5073_s11  ;;  %4803 = vmatprep.subr.bf16.mxu0 %v4802_v10 }
  0x16   : > { %4805 = vmatpush1.bf16.msra.mxu0 %v4804_v11  ;;  %v4506_v11 = vld [vmem:[%s5672_s1 + $0x8] sm:$0xff] }
  0x18   : > { %4948 = vrot.lane.b32.xlu0 %v4947_v9, %s5073_s11 }
  0x19   : > { %4958 = vrot.lane.b32.xlu1 %v4942_v4, %s5074_s12  ;;  %4509 = vmatmul.mubr.msk.f32.vlgmr.msra.gmra.mrb[0].mxu0 %vm349_vm0, %v5161_v12 }
  0x1a   : > { %730 = vmatprep.mubr.f32.mxu0 %v5072_v0 }
  0x1c   : > { %4963 = vrot.lane.b32.xlu0 %v4947_v9, %s5074_s12 }
  0x1d   : > { %4968 = vrot.lane.b32.xlu1 %v4952_v8, %s5074_s12 }
  0x20   : > { %4973 = vrot.lane.b32.xlu0 %v4942_v4, %s5075_s15 }
  0x21   : > { %4978 = vrot.lane.b32.xlu1 %v4947_v9, %s5075_s15 }
  0x24   : > { %4983 = vrot.lane.b32.xlu0 %v4952_v8, %s5075_s15 }
  0x25   : > { %4988 = vrot.lane.b32.xlu1 %v4942_v4, %s5076_s16 }
  0x28   : > { %4993 = vrot.lane.b32.xlu0 %v4947_v9, %s5076_s16 }
  0x29   : > { %4998 = vrot.lane.b32.xlu1 %v4952_v8, %s5076_s16 }
  0x2c   : > { %5003 = vrot.lane.b32.xlu0 %v4942_v4, %s5077_s17 }
  0x2d   : > { %5008 = vrot.lane.b32.xlu1 %v4947_v9, %s5077_s17 }
  0x30   : > { %5013 = vrot.lane.b32.xlu0 %v4952_v8, %s5077_s17 }
  0x31   : > { %5018 = vrot.lane.b32.xlu1 %v4942_v4, %s5078_s18 }
  0x34   : > { %5023 = vrot.lane.b32.xlu0 %v4947_v9, %s5078_s18 }
  0x35   : > { %5028 = vrot.lane.b32.xlu1 %v4952_v8, %s5078_s18 }
  0x38   : > { %5033 = vrot.lane.b32.xlu0 %v4942_v4, %s5079_s19 }
  0x39   : > { %5038 = vrot.lane.b32.xlu1 %v4947_v9, %s5079_s19 }
  0x3c   : > { %5043 = vrot.lane.b32.xlu0 %v4952_v8, %s5079_s19 }
  0x3d   : > { %5048 = vrot.lane.b32.xlu1 %v4942_v4, %s5080_s20 }
  0x40   : > { %5053 = vrot.lane.b32.xlu0 %v4947_v9, %s5080_s20 }
  0x41   : > { %5058 = vrot.lane.b32.xlu1 %v4952_v8, %s5080_s20 }
  0x44   : > { %1845 = vperm.xlu0 %5062, %v1842_v14   ;;  %v5082_v14 = vmov 0.0|0.0  }
  0x86   : > { %v5191_v16 = vpop.permute.xlu0 %4943 }
  0x87   : > { %v4954_v17 = vpop.permute.xlu1 %4953  ;;  %v4946_v18 = vunpack.i.h.bf16 %v5191_v16  ;;  %v4945_v19 = vunpack.i.l.bf16 %v5191_v16 }
  0x88   : > { %v4955_v20 = vunpack.i.l.bf16 %v4954_v17  ;;  %v4956_v22 = vunpack.i.h.bf16 %v4954_v17 }
  0x89   : > { %v654_v27 = vsel %vm652_vm1, %v4945_v19, %v4946_v18 }
  0x8a   : > { %v5195_v21 = vpop.permute.xlu0 %4948  ;;  %v653_v26 = vsel %vm652_vm1, %v4955_v20, %v4945_v19 }
  0x8b   : > { %v4951_v23 = vunpack.i.h.bf16 %v5195_v21  ;;  %v4950_v24 = vunpack.i.l.bf16 %v5195_v21  ;;  %v5199_v25 = vpop.permute.xlu1 %4958 }
  0x8c   : > { %v4961_v29 = vunpack.i.h.bf16 %v5199_v25  ;;  %v4960_v30 = vunpack.i.l.bf16 %v5199_v25 }
  0x8d   : > { %v655_v28 = vsel %vm652_vm1, %v4956_v22, %v4950_v24  ;;  %v656_v31 = vsel %vm652_vm1, %v4950_v24, %v4951_v23 }
  0x8e   : > { %v4811_v32 = vpack.c.bf16 %v655_v28, %v653_v26  ;;  %v5211_v33 = vpop.permute.xlu0 %4963  ;;  %v4809_v34 = vpack.c.bf16 %v656_v31, %v654_v27  ;;  %v826_v41 = vsel %vm824_vm2, %v4960_v30, %v4961_v29 }
  0x8f   : > { %v4966_v35 = vunpack.i.h.bf16 %v5211_v33  ;;  %v4965_v36 = vunpack.i.l.bf16 %v5211_v33  ;;  %v4969_v37 = vpop.permute.xlu1 %4968 }
  0x90   : > { %v4971_v38 = vunpack.i.h.bf16 %v4969_v37  ;;  %v4970_v39 = vunpack.i.l.bf16 %v4969_v37  ;;  %4810 = vmatprep.subr.bf16.mxu0 %v4809_v34 }
  0x91   : > { %4812 = vmatpush1.bf16.msra.mxu0 %v4811_v32  ;;  %v828_v42 = vsel %vm824_vm2, %v4965_v36, %v4966_v35 }
  0x92   : > { %v827_v43 = vsel %vm824_vm2, %v4971_v38, %v4965_v36  ;;  %v825_v44 = vsel %vm824_vm2, %v4970_v39, %v4960_v30  ;;  %v4974_v45 = vpop.permute.xlu0 %4973  ;;  %v4816_v46 = vpack.c.bf16 %v828_v42, %v826_v41  ;;  %v5277_v36 = vld [vmem:[%s5672_s1 + $0x20] sm:$0xff] }
  0x93   : > { %v4818_v47 = vpack.c.bf16 %v827_v43, %v825_v44  ;;  %v4976_v48 = vunpack.i.h.bf16 %v4974_v45  ;;  %v4975_v49 = vunpack.i.l.bf16 %v4974_v45  ;;  %v4979_v50 = vpop.permute.xlu1 %4978 }
  0x94   : > { %v4981_v51 = vunpack.i.h.bf16 %v4979_v50  ;;  %v4980_v52 = vunpack.i.l.bf16 %v4979_v50  ;;  %4512 = vmatmul.mubr.msk.f32.vlgmr.msra.gmra.mrb[0].mxu0 %vm349_vm0, %v5218_v40  ;;  %4817 = vmatprep.subr.bf16.mxu0 %v4816_v46 }
  0x95   : > { %4819 = vmatpush1.bf16.msra.mxu0 %v4818_v47  ;;  %v340_v53 = vsel %vm338_vm3, %v4975_v49, %v4976_v48  ;;  %902 = vmatprep.mubr.f32.mxu0 %v5072_v0 }
  0x96   : > { %v4984_v54 = vpop.permute.xlu0 %4983  ;;  %v342_v55 = vsel %vm338_vm3, %v4980_v52, %v4981_v51  ;;  %v4800_v19 = vpack.c.bf16 %v4981_v51, %v4976_v48 }
  0x97   : > { %v4986_v56 = vunpack.i.h.bf16 %v4984_v54  ;;  %v4985_v57 = vunpack.i.l.bf16 %v4984_v54  ;;  %v5233_v58 = vpop.permute.xlu1 %4988  ;;  %v4795_v59 = vpack.c.bf16 %v342_v55, %v340_v53 }
  0x98   : > { %v4991_v60 = vunpack.i.h.bf16 %v5233_v58  ;;  %v4990_v61 = vunpack.i.l.bf16 %v5233_v58 }
  0x99   : > { %4796 = vmatprep.subr.bf16.mxu1 %v4795_v59  ;;  %v339_v62 = vsel %vm338_vm3, %v4985_v57, %v4975_v49  ;;  %v341_v63 = vsel %vm338_vm3, %v4986_v56, %v4980_v52  ;;  %v4814_v49 = vpack.c.bf16 %v4951_v23, %v4946_v18  ;;  %v4520_v23 = vld [vmem:[%s5672_s1 + $0x28] sm:$0xff]  ;;  %v4821_v52 = vpack.c.bf16 %v4966_v35, %v4961_v29 }
  0x9a   : > { %v5244_v3 = vpop.permute.xlu0 %4993  ;;  %v4797_v4 = vpack.c.bf16 %v341_v63, %v339_v62  ;;  %v998_v15 = vsel %vm996_vm4, %v4990_v61, %v4991_v60 }
  0x9b   : > { %v4996_v5 = vunpack.i.h.bf16 %v5244_v3  ;;  %v4995_v6 = vunpack.i.l.bf16 %v5244_v3  ;;  %v4999_v8 = vpop.permute.xlu1 %4998 }
  0x9c   : > { %v5001_v9 = vunpack.i.h.bf16 %v4999_v8  ;;  %v5000_v10 = vunpack.i.l.bf16 %v4999_v8  ;;  %4798 = vmatpush1.bf16.msra.mxu1 %v4797_v4  ;;  %4515 = vmatmul.mubr.msk.f32.vlgmr.msra.gmra.mrb[0].mxu0 %vm349_vm0, %v5242_v1 }
  0x9d   : > { %4799 = vmatprep.subr.bf16.mxu1 %v5082_v14  ;;  %v1000_v17 = vsel %vm996_vm4, %v4995_v6, %v4996_v5  ;;  %1074 = vmatprep.mubr.f32.mxu0 %v5072_v0  ;;  %v4828_v35 = vpack.c.bf16 %v4996_v5, %v4991_v60 }
  0x9e   : > { %v999_v20 = vsel %vm996_vm4, %v5001_v9, %v4995_v6  ;;  %v997_v22 = vsel %vm996_vm4, %v5000_v10, %v4990_v61  ;;  %v5263_v24 = vpop.permute.xlu0 %5003  ;;  %v4823_v26 = vpack.c.bf16 %v1000_v17, %v998_v15 }
  0x9f   : > { %v4825_v27 = vpack.c.bf16 %v999_v20, %v997_v22  ;;  %v5006_v28 = vunpack.i.h.bf16 %v5263_v24  ;;  %v5005_v30 = vunpack.i.l.bf16 %v5263_v24  ;;  %v5267_v31 = vpop.permute.xlu1 %5008  ;;  %4507 = vmatmul.mubr.msk.f32.vlgmr.msra.gmra.mrb[0].mxu1 %vm349_vm0, %v4506_v11 }
  0xa0   : > { %v5011_v32 = vunpack.i.h.bf16 %v5267_v31  ;;  %v5010_v34 = vunpack.i.l.bf16 %v5267_v31  ;;  %4801 = vmatpush3.bf16.msra.mxu1 %v4800_v19  ;;  %4824 = vmatprep.subr.bf16.mxu0 %v4823_v26 }
  0xa1   : > { %4826 = vmatpush1.bf16.msra.mxu0 %v4825_v27  ;;  %4661 = vmatprep.mubr.msk.f32.mxu1 %vm5083_vm6, %v5072_v0  ;;  %v1170_v37 = vsel %vm1168_vm5, %v5005_v30, %v5006_v28 }
  0xa2   : > { %v5014_v38 = vpop.permute.xlu0 %5013  ;;  %4806 = vmatprep.subr.bf16.mxu1 %v5082_v14  ;;  %v1172_v39 = vsel %vm1168_vm5, %v5010_v34, %v5011_v32  ;;  %v4835_v10 = vpack.c.bf16 %v5011_v32, %v5006_v28 }
  0xa3   : > { %v5016_v41 = vunpack.i.h.bf16 %v5014_v38  ;;  %v5015_v42 = vunpack.i.l.bf16 %v5014_v38  ;;  %v5286_v43 = vpop.permute.xlu1 %5018  ;;  %4662 = vmatmul.mubr.msk.f32.vlgmr.msra.gmra.mrb[2].mxu1 %vm349_vm0, %v4506_v11  ;;  %v4830_v44 = vpack.c.bf16 %v1172_v39, %v1170_v37  ;;  %v4529_v39 = vld [vmem:[%s5672_s1 + $0x40] sm:$0xff] }
  0xa4   : > { %v5021_v45 = vunpack.i.h.bf16 %v5286_v43  ;;  %v5020_v46 = vunpack.i.l.bf16 %v5286_v43  ;;  %4808 = vmatpush3.bf16.msra.mxu1 %v4807_v13  ;;  %4518 = vmatmul.mubr.msk.f32.vlgmr.msra.gmra.mrb[0].mxu0 %vm349_vm0, %v5277_v36 }
  0xa5   : > { %v1169_v47 = vsel %vm1168_vm5, %v5015_v42, %v5005_v30  ;;  %v1171_v48 = vsel %vm1168_vm5, %v5016_v41, %v5010_v34  ;;  %4831 = vmatprep.subr.bf16.mxu0 %v4830_v44  ;;  %4668 = vmatprep.mubr.msk.f32.mxu1 %vm5083_vm6, %v5072_v0 }
  0xa6   : > { %v4832_v50 = vpack.c.bf16 %v1171_v48, %v1169_v47  ;;  %v5304_v2 = vpop.permute.xlu0 %5023  ;;  %4813 = vmatprep.subr.bf16.mxu1 %v5082_v14  ;;  %1246 = vmatprep.mubr.f32.mxu0 %v5072_v0  ;;  %v1342_v16 = vsel %vm1340_vm7, %v5020_v46, %v5021_v45 }
  0xa7   : > { %v5026_v7 = vunpack.i.h.bf16 %v5304_v2  ;;  %v5025_v13 = vunpack.i.l.bf16 %v5304_v2  ;;  %v5029_v51 = vpop.permute.xlu1 %5028  ;;  %4669 = vmatmul.mubr.msk.f32.vlgmr.msra.gmra.mrb[4].mxu1 %vm349_vm0, %v5161_v12 }
  0xa8   : > { %v5031_v18 = vunpack.i.h.bf16 %v5029_v51  ;;  %v5030_v21 = vunpack.i.l.bf16 %v5029_v51  ;;  %4815 = vmatpush3.bf16.msra.mxu1 %v4814_v49  ;;  %4833 = vmatpush1.bf16.msra.mxu0 %v4832_v50 }
  0xa9   : > { %4675 = vmatprep.mubr.msk.f32.mxu1 %vm5083_vm6, %v5072_v0  ;;  %4820 = vmatprep.subr.bf16.mxu1 %v5082_v14  ;;  %v1344_v12 = vsel %vm1340_vm7, %v5025_v13, %v5026_v7  ;;  %v4842_v24 = vpack.c.bf16 %v5026_v7, %v5021_v45 }
  0xaa   : > { %v1343_v53 = vsel %vm1340_vm7, %v5031_v18, %v5025_v13  ;;  %v1341_v54 = vsel %vm1340_vm7, %v5030_v21, %v5020_v46  ;;  %v5330_v55 = vpop.permute.xlu0 %5033  ;;  %v4837_v56 = vpack.c.bf16 %v1344_v12, %v1342_v16  ;;  %v1855_v12 = vlaneseq }
  0xab   : > { %v4839_v57 = vpack.c.bf16 %v1343_v53, %v1341_v54  ;;  %v5036_v59 = vunpack.i.h.bf16 %v5330_v55  ;;  %v5035_v61 = vunpack.i.l.bf16 %v5330_v55  ;;  %4676 = vmatmul.mubr.msk.f32.vlgmr.msra.gmra.mrb[6].mxu1 %vm349_vm0, %v5218_v40  ;;  %v5039_v62 = vpop.permute.xlu1 %5038 }
  0xac   : > { %4822 = vmatpush3.bf16.msra.mxu1 %v4821_v52  ;;  %4521 = vmatmul.mubr.msk.f32.vlgmr.msra.gmra.mrb[0].mxu0 %vm349_vm0, %v4520_v23  ;;  %v5041_v25 = vunpack.i.h.bf16 %v5039_v62  ;;  %v5040_v29 = vunpack.i.l.bf16 %v5039_v62  ;;  %v1856_v55 = vshrl.u32 %v1855_v12, 7 }
  0xad   : > { %4838 = vmatprep.subr.bf16.mxu0 %v4837_v56  ;;  %4682 = vmatprep.mubr.msk.f32.mxu1 %vm5083_vm6, %v5072_v0  ;;  %v1514_v33 = vsel %vm1512_vm8, %v5035_v61, %v5036_v59 }
  0xae   : > { %4840 = vmatpush1.bf16.msra.mxu0 %v4839_v57  ;;  %v5044_v63 = vpop.permute.xlu0 %5043  ;;  %4827 = vmatprep.subr.bf16.mxu1 %v5082_v14  ;;  %v1516_v40 = vsel %vm1512_vm8, %v5040_v29, %v5041_v25  ;;  %v4849_v37 = vpack.c.bf16 %v5041_v25, %v5036_v59 }
  0xaf   : > { %v5046_v4 = vunpack.i.h.bf16 %v5044_v63  ;;  %v5045_v6 = vunpack.i.l.bf16 %v5044_v63  ;;  %4683 = vmatmul.mubr.msk.f32.vlgmr.msra.gmra.mrb[8].mxu1 %vm349_vm0, %v5242_v1  ;;  %v5049_v8 = vpop.permute.xlu1 %5048  ;;  %1418 = vmatprep.mubr.f32.mxu0 %v5072_v0  ;;  %v4844_v9 = vpack.c.bf16 %v1516_v40, %v1514_v33  ;;  %v4523_v1 = vld [vmem:[%s5672_s1 + $0x30] sm:$0xff]  ;;  %v1857_v33 = vsub.s32 0, %v1856_v55 }
  0xb0   : > { %4829 = vmatpush3.bf16.msra.mxu1 %v4828_v35  ;;  %4689 = vmatprep.mubr.msk.f32.mxu1 %vm5083_vm6, %v5072_v0  ;;  %v5051_v58 = vunpack.i.h.bf16 %v5049_v8  ;;  %v5050_v60 = vunpack.i.l.bf16 %v5049_v8 }
  0xb1   : > { %v1513_v3 = vsel %vm1512_vm8, %v5045_v6, %v5035_v61  ;;  %v1515_v5 = vsel %vm1512_vm8, %v5046_v4, %v5040_v29  ;;  %4834 = vmatprep.subr.bf16.mxu1 %v5082_v14  ;;  %4845 = vmatprep.subr.bf16.mxu0 %v4844_v9  ;;  %v1865_v61 = vsub.s32 2, %v1856_v55  ;;  %v306_v29 = vld [vmem:[%s5678_s7] sm:$0x7] }
  0xb2   : > { %v4846_v11 = vpack.c.bf16 %v1515_v5, %v1513_v3  ;;  %v5054_v15 = vpop.permute.xlu0 %5053  ;;  %v1686_v22 = vsel %vm1684_vm9, %v5050_v60, %v5051_v58  ;;  %v5409_v3 = vrot.slane %v306_v29, %v1857_v33  ;;  %v1861_v5 = vsub.s32 1, %v1856_v55 }
  0xb3   : > { %4690 = vmatmul.mubr.msk.f32.vlgmr.msra.gmra.mrb[10].mxu1 %vm349_vm0, %v5277_v36  ;;  %v5056_v17 = vunpack.i.h.bf16 %v5054_v15  ;;  %v5055_v19 = vunpack.i.l.bf16 %v5054_v15  ;;  %v5059_v20 = vpop.permute.xlu1 %5058  ;;  %v4526_v36 = vld [vmem:[%s5672_s1 + $0x38] sm:$0xff] }
  0xb4   : > { %4836 = vmatpush3.bf16.msra.mxu1 %v4835_v10  ;;  %4524 = vmatmul.mubr.msk.f32.vlgmr.msra.gmra.mrb[0].mxu0 %vm349_vm0, %v4523_v1  ;;  %v5061_v26 = vunpack.i.h.bf16 %v5059_v20  ;;  %v5060_v27 = vunpack.i.l.bf16 %v5059_v20  ;;  %v5413_v20 = vrot.slane %v306_v29, %v1861_v5 }
  0xb5   : > { %4847 = vmatpush1.bf16.msra.mxu0 %v4846_v11  ;;  %4696 = vmatprep.mubr.msk.f32.mxu1 %vm5083_vm6, %v5072_v0  ;;  %v1688_v28 = vsel %vm1684_vm9, %v5055_v19, %v5056_v17  ;;  %v4856_v38 = vpack.c.bf16 %v5056_v17, %v5051_v58  ;;  %v5407_v58 = vrot.slane %v306_v29, %v1865_v61 }
  0xb6   : > { %v1687_v30 = vsel %vm1684_vm9, %v5061_v26, %v5055_v19  ;;  %v1685_v31 = vsel %vm1684_vm9, %v5060_v27, %v5050_v60  ;;  %4841 = vmatprep.subr.bf16.mxu1 %v5082_v14  ;;  %1590 = vmatprep.mubr.f32.mxu0 %v5072_v0  ;;  %v4851_v32 = vpack.c.bf16 %v1688_v28, %v1686_v22 }
  0xb7   : > { %4697 = vmatmul.mubr.msk.f32.vlgmr.msra.gmra.mrb[12].mxu1 %vm349_vm0, %v4520_v23  ;;  %v4853_v34 = vpack.c.bf16 %v1687_v30, %v1685_v31 }
  0xb8   : > { %4843 = vmatpush3.bf16.msra.mxu1 %v4842_v24  ;;  %4703 = vmatprep.mubr.msk.f32.mxu1 %vm5083_vm6, %v5072_v0 }
  0xb9   : > { %4848 = vmatprep.subr.bf16.mxu1 %v5082_v14  ;;  %4852 = vmatprep.subr.bf16.mxu0 %v4851_v32 }
  0xbb   : > { %4704 = vmatmul.mubr.msk.f32.vlgmr.msra.gmra.mrb[14].mxu1 %vm349_vm0, %v4523_v1 }
  0xbc   : > { %4527 = vmatmul.mubr.msk.f32.vlgmr.msra.gmra.mrb[0].mxu0 %vm349_vm0, %v4526_v36  ;;  %4850 = vmatpush3.bf16.msra.mxu1 %v4849_v37 }
  0xbd   : > { %4854 = vmatpush1.bf16.msra.mxu0 %v4853_v34  ;;  %4710 = vmatprep.mubr.msk.f32.mxu1 %vm5083_vm6, %v5072_v0  ;;  %v3321_v34 = vld [vmem:[%s5675_s4] sm:$0xff] }
  0xbe   : > { %4855 = vmatprep.subr.bf16.mxu1 %v5082_v14  ;;  %1762 = vmatprep.mubr.f32.mxu0 %v5072_v0 }
  0xbf   : > { %4711 = vmatmul.mubr.msk.f32.vlgmr.msra.gmra.mrb[16].mxu1 %vm349_vm0, %v4526_v36 }
  0xc0   : > { %4857 = vmatpush3.bf16.msra.mxu1 %v4856_v38  ;;  %4717 = vmatprep.mubr.msk.f32.mxu1 %vm5083_vm6, %v5072_v0 }
  0xc1   : > { %4720 = vmatprep.subr.mxu1 %v5072_v0 }
  0xc3   : > { %4718 = vmatmul.mubr.msk.f32.vlgmr.msra.gmra.mrb[18].mxu1 %vm349_vm0, %v4529_v39  ;;  %v1846_v25 = vpop.permute.xlu0 %1845 }
  0xc4   : > { %4530 = vmatmul.mubr.msk.f32.vlgmr.msra.gmra.mrb[0].mxu0 %vm349_vm0, %v4529_v39  ;;  %4722 = vmatprep.mubr.msk.f32.mxu1 %vm5083_vm6, %v5072_v0  ;;  %v4532_v39 = vld [vmem:[%s5674_s3 + $0x8] sm:$0xff] }
  0xc5   : > { %1980 = vmatprep.mubr.f32.mxu0 %v5072_v0 }
 0x172   : > { %v419_v14 = vpop.f32.mrb[0].mxu1 }
 0x173   : > { %v421_v41 = vpop.f32.mrb[1].mxu1 }
 0x176   : > { %v490_v42 = vpop.f32.mrb[2].mxu1 }
 0x177   : > { %v4663_v43 = vpop.f32.mrb[3].mxu1 }
 0x17a   : > { %v634_v44 = vpop.f32.mrb[4].mxu1 }
 0x17b   : > { %v635_v45 = vadd.f32 %v634_v44, %v490_v42  ;;  %v4670_v46 = vpop.f32.mrb[5].mxu1  ;;  %v1892_v44 = vld [vmem:[%s5674_s3] sm:$0xff] }
 0x17e   : > { %v803_v47 = vpop.f32.mrb[6].mxu1 }
 0x17f   : > { %v809_v48 = vadd.f32 %v803_v47, %v635_v45  ;;  %v4677_v49 = vpop.f32.mrb[7].mxu1 }
 0x182   : > { %v975_v50 = vpop.f32.mrb[8].mxu1 }
 0x183   : > { %v981_v2 = vadd.f32 %v975_v50, %v809_v48  ;;  %v4684_v7 = vpop.f32.mrb[9].mxu1  ;;  %v4537_v48 = vld [vmem:[%s5674_s3 + $0x10] sm:$0xff] }
 0x186   : > { %v1147_v13 = vpop.f32.mrb[10].mxu1 }
 0x187   : > { %v1153_v51 = vadd.f32 %v1147_v13, %v981_v2  ;;  %v4691_v16 = vpop.f32.mrb[11].mxu1  ;;  %v4540_v13 = vld [vmem:[%s5674_s3 + $0x18] sm:$0xff] }
 0x18a   : > { %v1319_v18 = vpop.f32.mrb[12].mxu1 }
 0x18b   : > { %v1325_v21 = vadd.f32 %v1319_v18, %v1153_v51  ;;  %v4698_v23 = vpop.f32.mrb[13].mxu1 }
 0x18e   : > { %v1491_v52 = vpop.f32.mrb[14].mxu1 }
 0x18f   : > { %v1497_v53 = vadd.f32 %v1491_v52, %v1325_v21  ;;  %v4705_v54 = vpop.f32.mrb[15].mxu1  ;;  %v4543_v21 = vld [vmem:[%s5674_s3 + $0x20] sm:$0xff] }
 0x190   : > { %v4546_v54 = vld [vmem:[%s5674_s3 + $0x28] sm:$0xff] }
 0x192   : > { %v1663_v56 = vpop.f32.mrb[16].mxu1 }
 0x193   : > { %v1669_v57 = vadd.f32 %v1663_v56, %v1497_v53  ;;  %v4712_v59 = vpop.f32.mrb[17].mxu1 }
 0x196   : > { %v1835_v62 = vpop.f32.mrb[18].mxu1 }
 0x197   : > { %v1841_v35 = vadd.f32 %v1835_v62, %v1669_v57  ;;  %v1764_v63 = vpop.f32.mrb[0].mxu0  ;;  %v4719_v40 = vpop.f32.mrb[19].mxu1  ;;  %v4549_v57 = vld [vmem:[%s5674_s3 + $0x30] sm:$0xff] }
 0x198   : > { %v4858_v4 = vadd.f32 %v1764_v63, %v419_v14  ;;  %v1766_v6 = vpop.f32.mrb[1].mxu0  ;;  %v4552_v40 = vld [vmem:[%s5674_s3 + $0x38] sm:$0xff] }
 0x199   : > { %v1850_v8 = vadd.f32 %v1846_v25, %v1841_v35  ;;  %v4859_v9 = vadd.f32 %v1766_v6, %v421_v41 }
 0x19a   : > { %v1848_v60 = vadd.f32 %v4858_v4, %v1846_v25 }
 0x19b   : > { %v1853_v1 = vmax.f32 %v1850_v8, 0.0  ;;  %v1849_v10 = vadd.f32 %v4859_v9, %v1846_v25  ;;  %v4555_v8 = vld [vmem:[%s5674_s3 + $0x40] sm:$0xff] }
 0x19c   : > { %v1851_v11 = vmax.f32 %v1848_v60, 0.0 }
 0x19d   : > { %v1872_v15 = vmul.f32 %v5407_v58, %v1853_v1  ;;  %v1852_v17 = vmax.f32 %v1849_v10, 0.0 }
 0x19e   : > { %v1870_v19 = vmul.f32 %v5409_v3, %v1851_v11 }
 0x19f   : > { %1880 = vrot.lane.b32.xlu0 %v1872_v15, %s5084_s13  ;;  %v1871_v22 = vmul.f32 %v5413_v20, %v1852_v17 }
 0x1a0   : > { %1876 = vrot.lane.b32.xlu1 %v1870_v19, %s5084_s13 }
 0x1a4   : > { %1878 = vrot.lane.b32.xlu1 %v1871_v22, %s5084_s13 }
 0x211   : > { %v1881_v27 = vpop.permute.xlu0 %1880 }
 0x212   : > { %v1877_v26 = vpop.permute.xlu1 %1876 }
 0x213   : > { %1888 = vst.msk [vmem:[#allocation2] sm:$0xff] %vm1887_vm12, %v1877_v26 }
 0x216   : > { %v1879_v24 = vpop.permute.xlu1 %1878 }
 0x217   : > { %v1882_v28 = vsel %vm307_vm10, %v1877_v26, %v1879_v24  ;;  %v1883_v30 = vsel %vm307_vm10, %v1879_v24, %v1881_v27 }
 0x218   : > { %1891 = vst.msk [vmem:[#allocation2 + $0x10] sm:$0xff] %vm1890_vm13, %v1883_v30  ;;  %1903 = vrot.lane.b32.xlu1 %v1882_v28, %s5075_s15 }
 0x21a   : > { %v1893_v31 = vld [vmem:[#allocation2] sm:$0xff] }
 0x21c   : > { %1901 = vrot.lane.b32.xlu1 %v1893_v31, %s5075_s15 }
 0x21f   : > { %v1895_v32 = vld [vmem:[#allocation2 + $0x10] sm:$0xff] }
 0x220   : > { %1905 = vrot.lane.b32.xlu0 %v1895_v32, %s5075_s15  ;;  %2207 = vrot.lane.b32.xlu1 %v1895_v32, %s5073_s11 }
 0x224   : > { %2205 = vrot.lane.b32.xlu0 %v1882_v28, %s5073_s11  ;;  %2365 = vrot.lane.b32.xlu1 %v1882_v28, %s5074_s12 }
 0x228   : > { %2203 = vrot.lane.b32.xlu0 %v1893_v31, %s5073_s11  ;;  %2363 = vrot.lane.b32.xlu1 %v1893_v31, %s5074_s12  ;;  %s305_s11 = scalar_lea.vmem %s5679_s8, %s4920_s29 }
 0x22c   : > { %2367 = vrot.lane.b32.xlu0 %v1895_v32, %s5074_s12  ;;  %2527 = vrot.lane.b32.xlu1 %v1895_v32, %s5076_s16 }
 0x230   : > { %2525 = vrot.lane.b32.xlu0 %v1882_v28, %s5076_s16  ;;  %2685 = vrot.lane.b32.xlu1 %v1882_v28, %s5077_s17 }
 0x234   : > { %2523 = vrot.lane.b32.xlu0 %v1893_v31, %s5076_s16  ;;  %2683 = vrot.lane.b32.xlu1 %v1893_v31, %s5077_s17 }
 0x238   : > { %2687 = vrot.lane.b32.xlu0 %v1895_v32, %s5077_s17  ;;  %2847 = vrot.lane.b32.xlu1 %v1895_v32, %s5078_s18 }
 0x23c   : > { %2845 = vrot.lane.b32.xlu0 %v1882_v28, %s5078_s18  ;;  %3005 = vrot.lane.b32.xlu1 %v1882_v28, %s5079_s19 }
 0x240   : > { %2843 = vrot.lane.b32.xlu0 %v1893_v31, %s5078_s18  ;;  %3003 = vrot.lane.b32.xlu1 %v1893_v31, %s5079_s19 }
 0x244   : > { %3007 = vrot.lane.b32.xlu0 %v1895_v32, %s5079_s19  ;;  %3167 = vrot.lane.b32.xlu1 %v1895_v32, %s5080_s20 }
 0x248   : > { %3165 = vrot.lane.b32.xlu0 %v1882_v28, %s5080_s20  ;;  %3324 = vperm.xlu1 %5063, %v3321_v34  }
 0x24c   : > { %3163 = vrot.lane.b32.xlu0 %v1893_v31, %s5080_s20 }
 0x28a   : > { %v1904_v36 = vpop.permute.xlu1 %1903 }
 0x28e   : > { %v1902_v37 = vpop.permute.xlu1 %1901 }
 0x28f   : > { %v1907_v42 = vsel %vm338_vm3, %v1902_v37, %v1904_v36 }
 0x292   : > { %v1906_v38 = vpop.permute.xlu0 %1905  ;;  %v2208_v14 = vpop.permute.xlu1 %2207 }
 0x293   : > { %4721 = vmatpush3.msra.mxu1 %v1906_v38  ;;  %v1908_v41 = vsel %vm338_vm3, %v1904_v36, %v1906_v38 }
 0x294   : > { %1916 = vmatprep.subr.mxu0 %v1908_v41  ;;  %4725 = vmatprep.subr.mxu1 %v5072_v0 }
 0x295   : > { %4723 = vmatmul.mubr.msk.f32.vlgmr.msra.gmra.mrb[20].mxu1 %vm1912_vm14, %v4532_v39  ;;  %1917 = vmatpush1.msra.mxu0 %v1907_v42 }
 0x296   : > { %4726 = vmatpush3.msra.mxu1 %v1895_v32  ;;  %v2206_v43 = vpop.permute.xlu0 %2205  ;;  %4533 = vmatmul.mubr.msk.f32.vlgmr.msra.gmra.mrb[2].mxu0 %vm1912_vm14, %v4532_v39  ;;  %v2366_v45 = vpop.permute.xlu1 %2365 }
 0x297   : > { %2060 = vmatprep.subr.mxu0 %v1882_v28  ;;  %4727 = vmatprep.mubr.msk.f32.mxu1 %vm5083_vm6, %v5072_v0  ;;  %v2210_v46 = vsel %vm652_vm1, %v2206_v43, %v2208_v14 }
 0x298   : > { %4730 = vmatprep.subr.mxu1 %v5072_v0  ;;  %2061 = vmatpush1.msra.mxu0 %v1893_v31 }
 0x299   : > { %4728 = vmatmul.mubr.msk.f32.vlgmr.msra.gmra.mrb[22].mxu1 %vm1912_vm14, %v1892_v44  ;;  %2217 = vmatprep.subr.mxu0 %v2210_v46 }
 0x29a   : > { %v2204_v47 = vpop.permute.xlu0 %2203  ;;  %4731 = vmatpush3.msra.mxu1 %v2208_v14  ;;  %4732 = vmatprep.mubr.msk.f32.mxu1 %vm5083_vm6, %v5072_v0  ;;  %v2364_v49 = vpop.permute.xlu1 %2363 }
 0x29b   : > { %4735 = vmatprep.subr.mxu1 %v5072_v0  ;;  %2124 = vmatprep.mubr.f32.mxu0 %v5072_v0  ;;  %v2209_v50 = vsel %vm652_vm1, %v2204_v47, %v2206_v43  ;;  %v2369_v23 = vsel %vm824_vm2, %v2364_v49, %v2366_v45 }
 0x29d   : > { %4733 = vmatmul.mubr.msk.f32.vlgmr.msra.gmra.mrb[24].mxu1 %vm1912_vm14, %v4537_v48 }
 0x29e   : > { %v2368_v2 = vpop.permute.xlu0 %2367  ;;  %4535 = vmatmul.mubr.msk.f32.vlgmr.msra.gmra.mrb[2].mxu0 %vm1912_vm14, %v1892_v44  ;;  %4737 = vmatprep.mubr.msk.f32.mxu1 %vm5083_vm6, %v5072_v0  ;;  %v2528_v7 = vpop.permute.xlu1 %2527 }
 0x29f   : > { %4736 = vmatpush3.msra.mxu1 %v2368_v2  ;;  %2218 = vmatpush1.msra.mxu0 %v2209_v50  ;;  %v2370_v51 = vsel %vm824_vm2, %v2366_v45, %v2368_v2 }
 0x2a0   : > { %2377 = vmatprep.subr.mxu0 %v2370_v51  ;;  %4740 = vmatprep.subr.mxu1 %v5072_v0 }
 0x2a1   : > { %4738 = vmatmul.mubr.msk.f32.vlgmr.msra.gmra.mrb[26].mxu1 %vm1912_vm14, %v4540_v13  ;;  %2281 = vmatprep.mubr.f32.mxu0 %v5072_v0 }
 0x2a2   : > { %v2526_v16 = vpop.permute.xlu0 %2525  ;;  %4741 = vmatpush3.msra.mxu1 %v2528_v7  ;;  %4742 = vmatprep.mubr.msk.f32.mxu1 %vm5083_vm6, %v5072_v0  ;;  %v2686_v18 = vpop.permute.xlu1 %2685 }
 0x2a3   : > { %4745 = vmatprep.subr.mxu1 %v5072_v0  ;;  %v2530_v53 = vsel %vm996_vm4, %v2526_v16, %v2528_v7 }
 0x2a5   : > { %4743 = vmatmul.mubr.msk.f32.vlgmr.msra.gmra.mrb[28].mxu1 %vm1912_vm14, %v4543_v21 }
 0x2a6   : > { %v2524_v12 = vpop.permute.xlu0 %2523  ;;  %4538 = vmatmul.mubr.msk.f32.vlgmr.msra.gmra.mrb[2].mxu0 %vm1912_vm14, %v4537_v48  ;;  %v2684_v52 = vpop.permute.xlu1 %2683  ;;  %4747 = vmatprep.mubr.msk.f32.mxu1 %vm5083_vm6, %v5072_v0 }
 0x2a7   : > { %2378 = vmatpush1.msra.mxu0 %v2369_v23  ;;  %2441 = vmatprep.mubr.f32.mxu0 %v5072_v0  ;;  %v2529_v59 = vsel %vm996_vm4, %v2524_v12, %v2526_v16  ;;  %v2689_v35 = vsel %vm1168_vm5, %v2684_v52, %v2686_v18 }
 0x2a8   : > { %2537 = vmatprep.subr.mxu0 %v2530_v53 }
 0x2aa   : > { %v2688_v55 = vpop.permute.xlu0 %2687  ;;  %v2848_v56 = vpop.permute.xlu1 %2847 }
 0x2ab   : > { %4746 = vmatpush3.msra.mxu1 %v2688_v55  ;;  %v2690_v25 = vsel %vm1168_vm5, %v2686_v18, %v2688_v55 }
 0x2ac   : > { %4750 = vmatprep.subr.mxu1 %v5072_v0  ;;  %4748 = vmatmul.mubr.msk.f32.vlgmr.msra.gmra.mrb[30].mxu1 %vm1912_vm14, %v4546_v54 }
 0x2ad   : > { %4751 = vmatpush3.msra.mxu1 %v2848_v56  ;;  %4752 = vmatprep.mubr.msk.f32.mxu1 %vm5083_vm6, %v5072_v0 }
 0x2ae   : > { %v2846_v61 = vpop.permute.xlu0 %2845  ;;  %4541 = vmatmul.mubr.msk.f32.vlgmr.msra.gmra.mrb[2].mxu0 %vm1912_vm14, %v4540_v13  ;;  %4755 = vmatprep.subr.mxu1 %v5072_v0  ;;  %v3006_v62 = vpop.permute.xlu1 %3005 }
 0x2af   : > { %2538 = vmatpush1.msra.mxu0 %v2529_v59  ;;  %2601 = vmatprep.mubr.f32.mxu0 %v5072_v0  ;;  %v2850_v4 = vsel %vm1340_vm7, %v2846_v61, %v2848_v56 }
 0x2b0   : > { %2697 = vmatprep.subr.mxu0 %v2690_v25  ;;  %4753 = vmatmul.mubr.msk.f32.vlgmr.msra.gmra.mrb[32].mxu1 %vm1912_vm14, %v4549_v57 }
 0x2b1   : > { %4757 = vmatprep.mubr.msk.f32.mxu1 %vm5083_vm6, %v5072_v0 }
 0x2b2   : > { %v2844_v29 = vpop.permute.xlu0 %2843  ;;  %v3004_v33 = vpop.permute.xlu1 %3003 }
 0x2b3   : > { %v2849_v9 = vsel %vm1340_vm7, %v2844_v29, %v2846_v61  ;;  %v3009_v1 = vsel %vm1512_vm8, %v3004_v33, %v3006_v62 }
 0x2b6   : > { %v3008_v63 = vpop.permute.xlu0 %3007  ;;  %4544 = vmatmul.mubr.msk.f32.vlgmr.msra.gmra.mrb[2].mxu0 %vm1912_vm14, %v4543_v21  ;;  %v3168_v6 = vpop.permute.xlu1 %3167 }
 0x2b7   : > { %4756 = vmatpush3.msra.mxu1 %v3008_v63  ;;  %2698 = vmatpush1.msra.mxu0 %v2689_v35  ;;  %v3010_v60 = vsel %vm1512_vm8, %v3006_v62, %v3008_v63  ;;  %v4415_v62 = vld [vmem:[%s5677_s6 + $0x8] sm:$0xff] }
 0x2b8   : > { %2857 = vmatprep.subr.mxu0 %v2850_v4  ;;  %4760 = vmatprep.subr.mxu1 %v5072_v0 }
 0x2b9   : > { %4758 = vmatmul.mubr.msk.f32.vlgmr.msra.gmra.mrb[34].mxu1 %vm1912_vm14, %v4552_v40  ;;  %2761 = vmatprep.mubr.f32.mxu0 %v5072_v0 }
 0x2ba   : > { %4761 = vmatpush3.msra.mxu1 %v3168_v6  ;;  %4762 = vmatprep.mubr.msk.f32.mxu1 %vm5083_vm6, %v5072_v0  ;;  %v3166_v5 = vpop.permute.xlu0 %3165 }
 0x2bb   : > { %v3170_v10 = vsel %vm1684_vm9, %v3166_v5, %v3168_v6 }
 0x2bd   : > { %4763 = vmatmul.mubr.msk.f32.vlgmr.msra.gmra.mrb[36].mxu1 %vm1912_vm14, %v4555_v8 }
 0x2be   : > { %4547 = vmatmul.mubr.msk.f32.vlgmr.msra.gmra.mrb[2].mxu0 %vm1912_vm14, %v4546_v54  ;;  %3445 = vmatprep.mubr.f32.mxu1 %v5072_v0  ;;  %v3164_v11 = vpop.permute.xlu0 %3163 }
 0x2bf   : > { %2858 = vmatpush1.msra.mxu0 %v2849_v9  ;;  %2921 = vmatprep.mubr.f32.mxu0 %v5072_v0  ;;  %v3169_v15 = vsel %vm1684_vm9, %v3164_v11, %v3166_v5 }
 0x2c0   : > { %3017 = vmatprep.subr.mxu0 %v3010_v60  ;;  %v4559_v60 = vld [vmem:[%s5676_s5 + $0x18] sm:$0xff] }
 0x2c6   : > { %4550 = vmatmul.mubr.msk.f32.vlgmr.msra.gmra.mrb[2].mxu0 %vm1912_vm14, %v4549_v57 }
 0x2c7   : > { %3018 = vmatpush1.msra.mxu0 %v3009_v1  ;;  %3081 = vmatprep.mubr.f32.mxu0 %v5072_v0  ;;  %v3325_v2 = vpop.permute.xlu1 %3324  ;;  %v3353_v1 = vld [vmem:[%s5676_s5] sm:$0xff] }
 0x2c8   : > { %3177 = vmatprep.subr.mxu0 %v3170_v10 }
 0x2ce   : > { %4553 = vmatmul.mubr.msk.f32.vlgmr.msra.gmra.mrb[2].mxu0 %vm1912_vm14, %v4552_v40  ;;  %v4558_v40 = vld [vmem:[%s5676_s5 + $0x10] sm:$0xff] }
 0x2cf   : > { %3178 = vmatpush1.msra.mxu0 %v3169_v15  ;;  %3241 = vmatprep.mubr.f32.mxu0 %v5072_v0 }
 0x2d6   : > { %4556 = vmatmul.mubr.msk.f32.vlgmr.msra.gmra.mrb[2].mxu0 %vm1912_vm14, %v4555_v8 }
 0x2d7   : > { %3614 = vmatprep.mubr.f32.mxu0 %v5072_v0 }
 0x368   : > { %v2053_v17 = vpop.f32.mrb[20].mxu1 }
 0x369   : > { %v4724_v19 = vpop.f32.mrb[21].mxu1 }
 0x36c   : > { %v2197_v22 = vpop.f32.mrb[22].mxu1 }
 0x36d   : > { %v2198_v26 = vadd.f32 %v2197_v22, %v2053_v17  ;;  %v4729_v27 = vpop.f32.mrb[23].mxu1  ;;  %v3354_v17 = vld [vmem:[%s5676_s5 + $0x8] sm:$0xff] }
 0x370   : > { %v2354_v24 = vpop.f32.mrb[24].mxu1 }
 0x371   : > { %v2360_v28 = vadd.f32 %v2354_v24, %v2198_v26  ;;  %v4734_v30 = vpop.f32.mrb[25].mxu1  ;;  %v4568_v24 = vld [vmem:[%s5676_s5 + $0x20] sm:$0xff] }
 0x374   : > { %v2514_v31 = vpop.f32.mrb[26].mxu1 }
 0x375   : > { %v2520_v32 = vadd.f32 %v2514_v31, %v2360_v28  ;;  %v4739_v34 = vpop.f32.mrb[27].mxu1 }
 0x378   : > { %v2674_v36 = vpop.f32.mrb[28].mxu1 }
 0x379   : > { %v2680_v37 = vadd.f32 %v2674_v36, %v2520_v32  ;;  %v4744_v38 = vpop.f32.mrb[29].mxu1  ;;  %v4569_v32 = vld [vmem:[%s5676_s5 + $0x28] sm:$0xff] }
 0x37a   : > { %v4574_v38 = vld [vmem:[%s5676_s5 + $0x30] sm:$0xff] }
 0x37f   : > { %v2834_v39 = vpop.f32.mrb[30].mxu1 }
 0x380   : > { %v2840_v14 = vadd.f32 %v2834_v39, %v2680_v37  ;;  %v4749_v41 = vpop.f32.mrb[31].mxu1 }
 0x383   : > { %v2994_v42 = vpop.f32.mrb[32].mxu1 }
 0x384   : > { %v3000_v43 = vadd.f32 %v2994_v42, %v2840_v14  ;;  %v4754_v44 = vpop.f32.mrb[33].mxu1 }
 0x38c   : > { %v3154_v45 = vpop.f32.mrb[34].mxu1 }
 0x38d   : > { %v3160_v46 = vadd.f32 %v3154_v45, %v3000_v43  ;;  %v4759_v47 = vpop.f32.mrb[35].mxu1  ;;  %v4575_v43 = vld [vmem:[%s5676_s5 + $0x38] sm:$0xff] }
 0x390   : > { %v3314_v48 = vpop.f32.mrb[36].mxu1 }
 0x391   : > { %v3320_v49 = vadd.f32 %v3314_v48, %v3160_v46  ;;  %v4764_v50 = vpop.f32.mrb[37].mxu1  ;;  %v4580_v46 = vld [vmem:[%s5676_s5 + $0x40] sm:$0xff]  ;;  %v4581_v48 = vld [vmem:[%s5676_s5 + $0x48] sm:$0xff] }
 0x392   : > { %v4587_v50 = vld [vmem:[%s5676_s5 + $0x58] sm:$0xff] }
 0x393   : > { %v3329_v13 = vadd.f32 %v3325_v2, %v3320_v49  ;;  %v4586_v49 = vld [vmem:[%s5676_s5 + $0x50] sm:$0xff] }
 0x395   : > { %v3332_v12 = vmax.f32 %v3329_v13, 0.0 }
 0x397   : > { %v3335_v54 = vmul.f32 %v3332_v12, %v5407_v58  ;;  %v4414_v58 = vld [vmem:[%s5677_s6] sm:$0xff] }
 0x3a9   : > { %v3243_v7 = vpop.f32.mrb[2].mxu0 }
 0x3aa   : > { %v3327_v51 = vadd.f32 %v3325_v2, %v3243_v7  ;;  %v3245_v16 = vpop.f32.mrb[3].mxu0 }
 0x3ab   : > { %v3328_v18 = vadd.f32 %v3325_v2, %v3245_v16 }
 0x3ac   : > { %v3330_v21 = vmax.f32 %v3327_v51, 0.0 }
 0x3ad   : > { %v3331_v23 = vmax.f32 %v3328_v18, 0.0 }
 0x3ae   : > { %v3333_v52 = vmul.f32 %v3330_v21, %v5409_v3 }
 0x3af   : > { %v3334_v53 = vmul.f32 %v3331_v23, %v5413_v20 }
 0x3b0   : > { %3339 = vrot.lane.b32.xlu0 %v3333_v52, %s5084_s13 }
 0x3b1   : > { %3341 = vrot.lane.b32.xlu1 %v3334_v53, %s5084_s13 }
 0x3b4   : > { %3343 = vrot.lane.b32.xlu0 %v3335_v54, %s5084_s13 }
 0x422   : > { %v3340_v55 = vpop.permute.xlu0 %3339 }
 0x423   : > { %3350 = vst.msk [vmem:[#allocation2] sm:$0xff] %vm1887_vm12, %v3340_v55  ;;  %v3342_v56 = vpop.permute.xlu1 %3341 }
 0x424   : > { %v3345_v57 = vsel %vm307_vm10, %v3340_v55, %v3342_v56 }
 0x425   : > { %3366 = vrot.lane.b32.xlu1 %v3345_v57, %s5076_s16 }
 0x426   : > { %v3344_v59 = vpop.permute.xlu0 %3343 }
 0x427   : > { %v3346_v3 = vsel %vm307_vm10, %v3342_v56, %v3344_v59 }
 0x428   : > { %3352 = vst.msk [vmem:[#allocation2 + $0x10] sm:$0xff] %vm1890_vm13, %v3346_v3 }
 0x42a   : > { %v3355_v20 = vld [vmem:[#allocation2] sm:$0xff] }
 0x42b   : > { %3364 = vrot.lane.b32.xlu1 %v3355_v20, %s5076_s16 }
 0x42f   : > { %v3357_v61 = vld [vmem:[#allocation2 + $0x10] sm:$0xff] }
 0x430   : > { %3368 = vrot.lane.b32.xlu0 %v3357_v61, %s5076_s16  ;;  %3537 = vrot.lane.b32.xlu1 %v3357_v61, %s5074_s12 }
 0x434   : > { %3535 = vrot.lane.b32.xlu0 %v3345_v57, %s5074_s12  ;;  %3707 = vrot.lane.b32.xlu1 %v3345_v57, %s5077_s17 }
 0x438   : > { %3533 = vrot.lane.b32.xlu0 %v3355_v20, %s5074_s12  ;;  %3705 = vrot.lane.b32.xlu1 %v3355_v20, %s5077_s17 }
 0x43c   : > { %3709 = vrot.lane.b32.xlu0 %v3357_v61, %s5077_s17  ;;  %3887 = vrot.lane.b32.xlu1 %v3357_v61, %s5078_s18 }
 0x440   : > { %3885 = vrot.lane.b32.xlu0 %v3345_v57, %s5078_s18  ;;  %4063 = vrot.lane.b32.xlu1 %v3345_v57, %s5079_s19 }
 0x444   : > { %3883 = vrot.lane.b32.xlu0 %v3355_v20, %s5078_s18  ;;  %4061 = vrot.lane.b32.xlu1 %v3355_v20, %s5079_s19 }
 0x448   : > { %4065 = vrot.lane.b32.xlu0 %v3357_v61, %s5079_s19  ;;  %4243 = vrot.lane.b32.xlu1 %v3357_v61, %s5080_s20 }
 0x44c   : > { %4241 = vrot.lane.b32.xlu0 %v3345_v57, %s5080_s20  ;;  %4418 = vperm.xlu1 %5063, %v4414_v58  }
 0x450   : > { %4239 = vrot.lane.b32.xlu0 %v3355_v20, %s5080_s20 }
 0x454   : > { %4423 = vperm.xlu0 %5062, %v4415_v62  }
 0x497   : > { %v3367_v25 = vpop.permute.xlu1 %3366 }
 0x49d   : > { %v3365_v29 = vpop.permute.xlu1 %3364 }
 0x49e   : > { %v3370_v4 = vsel %vm996_vm4, %v3365_v29, %v3367_v25 }
 0x4a2   : > { %v3369_v33 = vpop.permute.xlu0 %3368  ;;  %v3538_v35 = vpop.permute.xlu1 %3537 }
 0x4a3   : > { %v3371_v63 = vsel %vm996_vm4, %v3367_v25, %v3369_v33 }
 0x4a4   : > { %3381 = vmatprep.subr.mxu1 %v3371_v63 }
 0x4a5   : > { %3382 = vmatpush1.msra.mxu1 %v3370_v4 }
 0x4a6   : > { %4560 = vmatmul.mubr.msk.f32.vlgmr.msra.gmra.mrb[38].mxu1 %vm1912_vm14, %v4558_v40  ;;  %4765 = vmatprep.subr.mxu1 %v3369_v33  ;;  %v3536_v6 = vpop.permute.xlu0 %3535  ;;  %v3708_v8 = vpop.permute.xlu1 %3707 }
 0x4a7   : > { %4766 = vmatpush3.msra.mxu1 %v3369_v33  ;;  %3451 = vmatprep.mubr.f32.mxu1 %v5072_v0  ;;  %v3540_v9 = vsel %vm824_vm2, %v3536_v6, %v3538_v35 }
 0x4a8   : > { %4770 = vmatprep.subr.mxu1 %v3538_v35  ;;  %3550 = vmatprep.subr.mxu0 %v3540_v9 }
 0x4aa   : > { %4561 = vmatmul.mubr.msk.f32.gmra.mrb[40].mxu1 %vm1912_vm14, %v4559_v60  ;;  %v3534_v5 = vpop.permute.xlu0 %3533  ;;  %v3706_v10 = vpop.permute.xlu1 %3705 }
 0x4ab   : > { %v3539_v11 = vsel %vm824_vm2, %v3534_v5, %v3536_v6  ;;  %4767 = vmatprep.mubr.msk.f32.mxu1 %vm1912_vm14, %v4558_v40  ;;  %v3711_v26 = vsel %vm1168_vm5, %v3706_v10, %v3708_v8 }
 0x4ac   : > { %3551 = vmatpush1.msra.mxu0 %v3539_v11 }
 0x4ad   : > { %4564 = vmatmul.mubr.msk.f32.vlgmr.msra.gmra.mrb[4].mxu0 %vm1912_vm14, %v3353_v1 }
 0x4ae   : > { %4768 = vmatmul.mubr.msk.f32.vlgmr.msra.gmra.mrb[42].mxu1 %vm1912_vm14, %v4559_v60  ;;  %v3710_v15 = vpop.permute.xlu0 %3709  ;;  %3620 = vmatprep.mubr.f32.mxu0 %v5072_v0  ;;  %v3888_v19 = vpop.permute.xlu1 %3887 }
 0x4af   : > { %4771 = vmatpush3.msra.mxu1 %v3538_v35  ;;  %v3712_v22 = vsel %vm1168_vm5, %v3708_v8, %v3710_v15  ;;  %4772 = vmatprep.mubr.msk.f32.mxu1 %vm1912_vm14, %v3353_v1 }
 0x4b0   : > { %4775 = vmatprep.subr.mxu1 %v3710_v15  ;;  %3722 = vmatprep.subr.mxu0 %v3712_v22 }
 0x4b1   : > { %4565 = vmatmul.mubr.msk.f32.gmra.mrb[6].mxu0 %vm1912_vm14, %v3354_v17 }
 0x4b2   : > { %3723 = vmatpush1.msra.mxu0 %v3711_v26  ;;  %v3886_v27 = vpop.permute.xlu0 %3885  ;;  %3786 = vmatprep.mubr.f32.mxu0 %v5072_v0  ;;  %v4064_v28 = vpop.permute.xlu1 %4063 }
 0x4b3   : > { %v3890_v30 = vsel %vm1340_vm7, %v3886_v27, %v3888_v19 }
 0x4b4   : > { %3900 = vmatprep.subr.mxu0 %v3890_v30 }
 0x4b5   : > { %4570 = vmatmul.mubr.msk.f32.vlgmr.msra.gmra.mrb[4].mxu0 %vm1912_vm14, %v4568_v24 }
 0x4b6   : > { %4773 = vmatmul.mubr.msk.f32.vlgmr.msra.gmra.mrb[42].mxu1 %vm1912_vm14, %v3354_v17  ;;  %v3884_v31 = vpop.permute.xlu0 %3883  ;;  %3792 = vmatprep.mubr.f32.mxu0 %v5072_v0  ;;  %v4062_v36 = vpop.permute.xlu1 %4061 }
 0x4b7   : > { %4776 = vmatpush3.msra.mxu1 %v3710_v15  ;;  %v3889_v34 = vsel %vm1340_vm7, %v3884_v31, %v3886_v27  ;;  %4777 = vmatprep.mubr.msk.f32.mxu1 %vm1912_vm14, %v4568_v24  ;;  %v4067_v14 = vsel %vm1512_vm8, %v4062_v36, %v4064_v28 }
 0x4b8   : > { %4780 = vmatprep.subr.mxu1 %v3888_v19  ;;  %3901 = vmatpush1.msra.mxu0 %v3889_v34 }
 0x4b9   : > { %4571 = vmatmul.mubr.msk.f32.gmra.mrb[6].mxu0 %vm1912_vm14, %v4569_v32 }
 0x4ba   : > { %v4066_v37 = vpop.permute.xlu0 %4065  ;;  %3964 = vmatprep.mubr.f32.mxu0 %v5072_v0  ;;  %v4244_v42 = vpop.permute.xlu1 %4243 }
 0x4bb   : > { %v4068_v39 = vsel %vm1512_vm8, %v4064_v28, %v4066_v37 }
 0x4bc   : > { %4078 = vmatprep.subr.mxu0 %v4068_v39 }
 0x4bd   : > { %4576 = vmatmul.mubr.msk.f32.vlgmr.msra.gmra.mrb[4].mxu0 %vm1912_vm14, %v4574_v38 }
 0x4be   : > { %4079 = vmatpush1.msra.mxu0 %v4067_v14  ;;  %4778 = vmatmul.mubr.msk.f32.vlgmr.msra.gmra.mrb[42].mxu1 %vm1912_vm14, %v4569_v32  ;;  %v4242_v41 = vpop.permute.xlu0 %4241 }
 0x4bf   : > { %4781 = vmatpush3.msra.mxu1 %v3888_v19  ;;  %3970 = vmatprep.mubr.f32.mxu0 %v5072_v0  ;;  %v4246_v44 = vsel %vm1684_vm9, %v4242_v41, %v4244_v42 }
 0x4c0   : > { %4785 = vmatprep.subr.mxu1 %v4066_v37  ;;  %4256 = vmatprep.subr.mxu0 %v4246_v44 }
 0x4c1   : > { %4577 = vmatmul.mubr.msk.f32.gmra.mrb[6].mxu0 %vm1912_vm14, %v4575_v43  ;;  %4782 = vmatprep.mubr.msk.f32.mxu1 %vm1912_vm14, %v4574_v38 }
 0x4c2   : > { %v4240_v45 = vpop.permute.xlu0 %4239  ;;  %4142 = vmatprep.mubr.f32.mxu0 %v5072_v0 }
 0x4c3   : > { %v4245_v47 = vsel %vm1684_vm9, %v4240_v45, %v4242_v41 }
 0x4c5   : > { %4582 = vmatmul.mubr.msk.f32.vlgmr.msra.gmra.mrb[4].mxu0 %vm1912_vm14, %v4580_v46 }
 0x4c6   : > { %4257 = vmatpush1.msra.mxu0 %v4245_v47  ;;  %4783 = vmatmul.mubr.msk.f32.vlgmr.msra.gmra.mrb[42].mxu1 %vm1912_vm14, %v4575_v43 }
 0x4c7   : > { %4786 = vmatpush3.msra.mxu1 %v4066_v37  ;;  %4148 = vmatprep.mubr.f32.mxu0 %v5072_v0 }
 0x4c8   : > { %4790 = vmatprep.subr.mxu1 %v4244_v42  ;;  %4787 = vmatprep.mubr.msk.f32.mxu1 %vm1912_vm14, %v4580_v46 }
 0x4c9   : > { %4583 = vmatmul.mubr.msk.f32.gmra.mrb[6].mxu0 %vm1912_vm14, %v4581_v48 }
 0x4ca   : > { %4320 = vmatprep.mubr.f32.mxu0 %v5072_v0 }
 0x4cd   : > { %4588 = vmatmul.mubr.msk.f32.vlgmr.msra.gmra.mrb[4].mxu0 %vm1912_vm14, %v4586_v49 }
 0x4ce   : > { %4788 = vmatmul.mubr.msk.f32.vlgmr.msra.gmra.mrb[42].mxu1 %vm1912_vm14, %v4581_v48  ;;  %4326 = vmatprep.mubr.f32.mxu0 %v5072_v0  ;;  %v4419_v0 = vpop.permute.xlu1 %4418 }
 0x4cf   : > { %4791 = vmatpush3.msra.mxu1 %v4244_v42  ;;  %4792 = vmatprep.mubr.msk.f32.mxu1 %vm1912_vm14, %v4586_v49 }
 0x4d1   : > { %4589 = vmatmul.mubr.msk.f32.gmra.mrb[6].mxu0 %vm1912_vm14, %v4587_v50 }
 0x4d3   : > { %v4424_v57 = vpop.permute.xlu0 %4423 }
 0x4d6   : > { %4793 = vmatmul.mubr.msk.f32.vlgmr.msra.gmra.mrb[42].mxu1 %vm1912_vm14, %v4587_v50 }
 0x579   : > { %v3447_v2 = vpop.f32.mrb[38].mxu1 }
 0x57a   : > { %v3449_v7 = vpop.f32.mrb[39].mxu1 }
 0x57d   : > { %v3453_v13 = vpop.f32.mrb[40].mxu1 }
 0x57e   : > { %v3455_v51 = vpop.f32.mrb[41].mxu1 }
 0x5a0   : > { %v4322_v16 = vpop.f32.mrb[4].mxu0 }
 0x5a1   : > { %v4860_v18 = vadd.f32 %v4322_v16, %v3447_v2  ;;  %v4324_v21 = vpop.f32.mrb[5].mxu0 }
 0x5a2   : > { %v4861_v23 = vadd.f32 %v4324_v21, %v3449_v7 }
 0x5a3   : > { %v4426_v12 = vadd.f32 %v4860_v18, %v4419_v0 }
 0x5a4   : > { %v4427_v52 = vadd.f32 %v4861_v23, %v4419_v0  ;;  %v4328_v53 = vpop.f32.mrb[6].mxu0 }
 0x5a5   : > { %v4432_v54 = vmax.f32 %v4426_v12, 0.0  ;;  %v4862_v55 = vadd.f32 %v4328_v53, %v3453_v13  ;;  %v4330_v56 = vpop.f32.mrb[7].mxu0 }
 0x5a6   : > { %v4433_v59 = vmax.f32 %v4427_v52, 0.0  ;;  %v4863_v3 = vadd.f32 %v4330_v56, %v3455_v51 }
 0x5a7   : > { %4438 = vst [vmem:[%s305_s11] sm:$0xff] %v4432_v54  ;;  %v4429_v20 = vadd.f32 %v4862_v55, %v4424_v57 }
 0x5a8   : > { %4439 = vst [vmem:[%s305_s11 + $0x8] sm:$0xff] %v4433_v59  ;;  %v4430_v61 = vadd.f32 %v4863_v3, %v4424_v57 }
 0x5a9   : > { %v4435_v58 = vmax.f32 %v4429_v20, 0.0  ;;  %v4794_v62 = vpop.f32.mrb[42].mxu1 }
 0x5aa   : > { %v4436_v25 = vmax.f32 %v4430_v61, 0.0  ;;  %v4431_v29 = vadd.f32 %v4794_v62, %v4424_v57  ;;  %v4399_v33 = vpop.f32.mrb[43].mxu1 }
 0x5ab   : > { %4441 = vst [vmem:[%s305_s11 + $0x18] sm:$0xff] %v4435_v58  ;;  %v4428_v35 = vadd.f32 %v4419_v0, %v4399_v33 }
 0x5ac   : > { %4442 = vst [vmem:[%s305_s11 + $0x20] sm:$0xff] %v4436_v25  ;;  %v4437_v63 = vmax.f32 %v4431_v29, 0.0 }
 0x5ad   : > { %v4434_v40 = vmax.f32 %v4428_v35, 0.0 }
 0x5ae   : > { %4443 = vst.msk [vmem:[%s305_s11 + $0x28] sm:$0xff] %vm349_vm0, %v4437_v63 }
 0x5af   : > { %4440 = vst.msk [vmem:[%s305_s11 + $0x10] sm:$0xff] %vm349_vm0, %v4434_v40 }
 0x5b0 PF: > { %s18_s27 = sadd.s32 1, %s5070_s27  }
 0x5b1   : > { %p15_p4 = scmp.ge.s32.totalorder %s18_s27, 4  }
 0x5b3   :  { %17 = sbr.rel (!%p15_p4) target bundleno = 1 (0x1), region = 103 }

</bundles_post_ra>
